<compile_context>
chip_gen: v7x
topology: tpu7x:2x2x1
jax: 0.10.0
libtpu: 0.0.40
codegen_flags: <defaults>
</compile_context>

<pallas_src>
import functools

import numpy as np
import jax
import jax.numpy as jnp
from jax.experimental import pallas as pl
from jax.experimental.pallas import tpu as pltpu


def _round_up(n, m):
    return ((n + m - 1) // m) * m


def single_stage_kernel(t_ref, x_ref, win_ref, bin_ref, wd_ref, bd_ref,
                        w1_ref, b1_ref, wout_ref, bout_ref, out_ref, *, seq_len):
    # t_ref:    (1, GT)   int32 time index of each lane within its sequence
    # x_ref:    (Dp, GT)  bf16  G whole sequences folded along the lane axis
    # win_ref:  (C, Dp)   bf16   bin_ref:  (C, 1)  f32
    # wd_ref:   (L, C, 3C) bf16 fused dilated taps [t-d | t | t+d]
    # bd_ref:   (L, C, 1) f32
    # w1_ref:   (L, C, C) bf16   b1_ref:   (L, C, 1) f32
    # wout_ref: (Kp, C)   bf16   bout_ref: (Kp, 1) f32
    # out_ref:  (Kp, GT)  f32
    L = wd_ref.shape[0]
    lanes = x_ref.shape[-1]
    t = t_ref[...]                       # (1, GT); broadcasts over channel rows

    # Input 1x1 conv: bf16 operands on the MXU, f32 accumulation.
    cur = jnp.dot(win_ref[...], x_ref[...],
                  preferred_element_type=jnp.float32) + bin_ref[...]

    for l in range(L):                   # statically unrolled; L is small
        d = 2 ** l
        cur_b = cur.astype(jnp.bfloat16)
        # Neighbours at t-d / t+d via XLU lane rotation; zero the lanes whose
        # source wrapped out of the current sequence (this also handles the
        # seams between the sequences folded into the lane axis).
        x_left = jnp.where(t >= d,
                           pltpu.roll(cur, d, axis=1),
                           0.0).astype(jnp.bfloat16)
        x_right = jnp.where(t < seq_len - d,
                            pltpu.roll(cur, lanes - d, axis=1),
                            0.0).astype(jnp.bfloat16)
        # Fused k=3 dilated conv: one (C,3C)@(3C,GT) matmul (C is 8-aligned,
        # so the sublane stack is cheap).
        xcat = jnp.concatenate([x_left, cur_b, x_right], axis=0)
        y = jnp.dot(wd_ref[l], xcat,
                    preferred_element_type=jnp.float32) + bd_ref[l]
        y = jnp.maximum(y, 0.0)                                      # ReLU (f32)
        y = jnp.dot(w1_ref[l], y.astype(jnp.bfloat16),
                    preferred_element_type=jnp.float32) + b1_ref[l]
        cur = cur + y                                                # residual (f32)

    out_ref[...] = (jnp.dot(wout_ref[...], cur.astype(jnp.bfloat16),
                            preferred_element_type=jnp.float32)
                    + bout_ref[...]).astype(out_ref.dtype)


def single_stage_forward(x, params):
    """x: (B, dim, T) float32. params: dict of conv weights/biases (PyTorch layouts)."""
    B, D, T = x.shape
    C = params["w_in"].shape[0]
    K = params["w_out"].shape[0]
    L = params["wd"].shape[0]
    assert C % 8 == 0, "num_f_maps must be a multiple of 8"

    # Fold groups of G whole sequences into the lane axis. Sequences are
    # independent, so no halo is needed and the group axis can be "parallel"
    # (uses both TensorCores on v7x when there is more than one group).
    lane_target = 1024
    G = 1
    for g in range(min(B, max(1, lane_target // T)), 0, -1):
        if B % g == 0:
            G = g
            break
    NG = B // G
    GT = G * T

    Dp = _round_up(D, 8)
    Kp = _round_up(K, 8)       # pad classes -> unmasked lane-dense output store
    GTp = _round_up(GT, 128)   # lane-dense blocks

    # ---- layout plumbing (wrapper side, free relative to the kernel) -------
    # x: (B, D, T) -> (NG, D, G*T), bf16 operands for the MXU.
    x_f = x.reshape(NG, G, D, T).transpose(0, 2, 1, 3).reshape(NG, D, GT)
    x_f = jnp.pad(x_f, ((0, 0), (0, Dp - D), (0, GTp - GT))).astype(jnp.bfloat16)

    # Per-lane time index within its sequence (mask for the rolled neighbours).
    t_idx = jnp.tile(jnp.arange(T, dtype=jnp.int32), G)
    t_idx = jnp.pad(t_idx, (0, GTp - GT)).reshape(1, GTp)

    # Fused dilated taps: (L, C_out, C_in, 3) -> (L, C, 3C); column blocks
    # multiply the stacked [x(t-d); x(t); x(t+d)] activations.
    wd = jnp.concatenate([params["wd"][..., k] for k in range(3)], axis=2)

    w_in = jnp.pad(params["w_in"], ((0, 0), (0, Dp - D)))
    w_out = jnp.pad(params["w_out"], ((0, Kp - K), (0, 0)))
    b_out = jnp.pad(params["b_out"], (0, Kp - K))

    bf16 = jnp.bfloat16
    args = (
        t_idx, x_f,
        w_in.astype(bf16), params["b_in"].reshape(C, 1),
        wd.astype(bf16), params["bd"].reshape(L, C, 1),
        params["w1"].astype(bf16), params["b1"].reshape(L, C, 1),
        w_out.astype(bf16), b_out.reshape(Kp, 1),
    )

    def resident(shape):
        # Full-array block whose index never changes -> stays resident in VMEM.
        return pl.BlockSpec(shape, lambda i: (0,) * len(shape))

    out_p = pl.pallas_call(
        functools.partial(single_stage_kernel, seq_len=T),
        out_shape=jax.ShapeDtypeStruct((NG, Kp, GTp), jnp.float32),
        grid=(NG,),
        in_specs=[
            resident((1, GTp)),                                  # t_idx
            pl.BlockSpec((None, Dp, GTp), lambda i: (i, 0, 0)),  # x, one group
            resident((C, Dp)), resident((C, 1)),
            resident((L, C, 3 * C)), resident((L, C, 1)),
            resident((L, C, C)), resident((L, C, 1)),
            resident((Kp, C)), resident((Kp, 1)),
        ],
        out_specs=pl.BlockSpec((None, Kp, GTp), lambda i: (i, 0, 0)),
        compiler_params=pltpu.CompilerParams(
            dimension_semantics=("parallel",)),
    )(*args)

    # Un-fold lanes back to (B, K, T) and drop the class / lane padding.
    out = out_p[:, :K, :GT].reshape(NG, K, G, T).transpose(0, 2, 1, 3)
    return out.reshape(B, K, T)


def single_stage_reference(x, params):
    """Pure-JAX (f32, lax conv) reference of the same forward, for checking."""
    def conv1d(x, w, b, dilation, padding):
        y = jax.lax.conv_general_dilated(
            x, w, window_strides=(1,), padding=[(padding, padding)],
            rhs_dilation=(dilation,), dimension_numbers=("NCH", "OIH", "NCH"))
        return y + b[None, :, None]

    L = params["wd"].shape[0]
    out = conv1d(x, params["w_in"][:, :, None], params["b_in"], 1, 0)
    for l in range(L):
        d = 2 ** l
        y = jax.nn.relu(conv1d(out, params["wd"][l], params["bd"][l], d, d))
        y = conv1d(y, params["w1"][l][:, :, None], params["b1"][l], 1, 0)
        out = out + y
    return conv1d(out, params["w_out"][:, :, None], params["b_out"], 1, 0)


if __name__ == "__main__":
    # Small shapes consistent with the module.
    B = 2      # batch
    D = 16     # dim (input feature channels)
    C = 32     # num_f_maps
    K = 10     # num_classes
    L = 4      # num_layers  -> dilations 1, 2, 4, 8
    T = 128    # sequence length

    key = jax.random.PRNGKey(0)
    ks = jax.random.split(key, 12)

    def init(k, shape, fan_in):
        bound = 1.0 / np.sqrt(fan_in)
        return jax.random.uniform(k, shape, jnp.float32, -bound, bound)

    params = {
        "w_in": init(ks[0], (C, D), D),           "b_in": init(ks[1], (C,), D),
        "wd":   init(ks[2], (L, C, C, 3), C * 3), "bd":   init(ks[3], (L, C), C * 3),
        "w1":   init(ks[4], (L, C, C), C),        "b1":   init(ks[5], (L, C), C),
        "w_out": init(ks[6], (K, C), C),          "b_out": init(ks[7], (K,), C),
    }
    x = jax.random.normal(ks[8], (B, D, T), jnp.float32)

    out = single_stage_forward(x, params)
    jax.block_until_ready(out)

    ref = single_stage_reference(x, params)
    assert out.shape == (B, K, T)
    # bf16 matmul operands (f32 accumulation) -> loosened tolerance vs f32 ref.
    assert jnp.allclose(out, ref, atol=5e-2, rtol=5e-2), (
        float(jnp.max(jnp.abs(out - ref))))

    print("KERNEL_OK")
</pallas_src>

<mosaic_0001>
module attributes {stable_mosaic.version = 11 : i64} {
  func.func @single_stage_kernel(%arg0: i32, %arg1: memref<1x256xi32, #tpu.memory_space<vmem>>, %arg2: memref<1x16x256xbf16, #tpu.memory_space<vmem>>, %arg3: memref<32x16xbf16, #tpu.memory_space<vmem>>, %arg4: memref<32x1xf32, #tpu.memory_space<vmem>>, %arg5: memref<4x32x96xbf16, #tpu.memory_space<vmem>>, %arg6: memref<4x32x1xf32, #tpu.memory_space<vmem>>, %arg7: memref<4x32x32xbf16, #tpu.memory_space<vmem>>, %arg8: memref<4x32x1xf32, #tpu.memory_space<vmem>>, %arg9: memref<16x32xbf16, #tpu.memory_space<vmem>>, %arg10: memref<16x1xf32, #tpu.memory_space<vmem>>, %arg11: memref<1x16x256xf32, #tpu.memory_space<vmem>>) attributes {dimension_semantics = [#tpu.dimension_semantics<parallel>], iteration_bounds = array<i64: 1>, scalar_prefetch = 0 : i64, scratch_operands = 0 : i64, tpu.core_type = #tpu.core_type<tc>, window_params = [{pipeline_mode = #tpu.pipeline_mode<synchronous>, transform_indices = @transform_0, window_bounds = array<i64: 1, 256>}, {transform_indices = @transform_1, window_bounds = array<i64: 1, 16, 256>}, {pipeline_mode = #tpu.pipeline_mode<synchronous>, transform_indices = @transform_2, window_bounds = array<i64: 32, 16>}, {pipeline_mode = #tpu.pipeline_mode<synchronous>, transform_indices = @transform_3, window_bounds = array<i64: 32, 1>}, {pipeline_mode = #tpu.pipeline_mode<synchronous>, transform_indices = @transform_4, window_bounds = array<i64: 4, 32, 96>}, {pipeline_mode = #tpu.pipeline_mode<synchronous>, transform_indices = @transform_5, window_bounds = array<i64: 4, 32, 1>}, {pipeline_mode = #tpu.pipeline_mode<synchronous>, transform_indices = @transform_6, window_bounds = array<i64: 4, 32, 32>}, {pipeline_mode = #tpu.pipeline_mode<synchronous>, transform_indices = @transform_7, window_bounds = array<i64: 4, 32, 1>}, {pipeline_mode = #tpu.pipeline_mode<synchronous>, transform_indices = @transform_8, window_bounds = array<i64: 16, 32>}, {pipeline_mode = #tpu.pipeline_mode<synchronous>, transform_indices = @transform_9, window_bounds = array<i64: 16, 1>}, {transform_indices = @transform_10, window_bounds = array<i64: 1, 16, 256>}]} {
    %c0 = arith.constant 0 : index
    %c0_0 = arith.constant 0 : index
    %0 = vector.load %arg1[%c0, %c0_0] : memref<1x256xi32, #tpu.memory_space<vmem>>, vector<1x256xi32>
    %c0_1 = arith.constant 0 : index
    %c0_2 = arith.constant 0 : index
    %1 = vector.load %arg3[%c0_1, %c0_2] : memref<32x16xbf16, #tpu.memory_space<vmem>>, vector<32x16xbf16>
    %c0_3 = arith.constant 0 : index
    %c0_4 = arith.constant 0 : index
    %c0_5 = arith.constant 0 : index
    %2 = vector.load %arg2[%c0_3, %c0_4, %c0_5] : memref<1x16x256xbf16, #tpu.memory_space<vmem>>, vector<1x16x256xbf16>
    %3 = vector.shape_cast %2 : vector<1x16x256xbf16> to vector<16x256xbf16>
    %cst = arith.constant dense<0.000000e+00> : vector<32x256xf32>
    %4 = tpu.matmul %1, %3, %cst {dimension_numbers = #tpu.dot_dimension_numbers<[1], [0], [0], [1], [0, 0, 1, 1], [], []>} : vector<32x16xbf16>, vector<16x256xbf16>, vector<32x256xf32> -> vector<32x256xf32>
    %c0_6 = arith.constant 0 : index
    %c0_7 = arith.constant 0 : index
    %5 = vector.load %arg4[%c0_6, %c0_7] : memref<32x1xf32, #tpu.memory_space<vmem>>, vector<32x1xf32>
    %6 = vector.broadcast %5 : vector<32x1xf32> to vector<32x256xf32>
    %7 = arith.addf %4, %6 : vector<32x256xf32>
    %8 = arith.truncf %7 : vector<32x256xf32> to vector<32x256xbf16>
    %c1_i32 = arith.constant 1 : i32
    %9 = vector.broadcast %c1_i32 : i32 to vector<1x256xi32>
    %10 = arith.cmpi sge, %0, %9 : vector<1x256xi32>
    %c1_i32_8 = arith.constant 1 : i32
    %11 = tpu.dynamic_rotate %7 by %c1_i32_8 dim 1 : vector<32x256xf32>, i32 -> vector<32x256xf32>
    %cst_9 = arith.constant 0.000000e+00 : f32
    %12 = vector.shape_cast %10 : vector<1x256xi1> to vector<1x256xi1>
    %13 = vector.broadcast %12 : vector<1x256xi1> to vector<32x256xi1>
    %14 = vector.broadcast %cst_9 : f32 to vector<32x256xf32>
    %15 = arith.select %13, %11, %14 : vector<32x256xi1>, vector<32x256xf32>
    %16 = arith.truncf %15 : vector<32x256xf32> to vector<32x256xbf16>
    %c127_i32 = arith.constant 127 : i32
    %17 = vector.broadcast %c127_i32 : i32 to vector<1x256xi32>
    %18 = arith.cmpi slt, %0, %17 : vector<1x256xi32>
    %c255_i32 = arith.constant 255 : i32
    %19 = tpu.dynamic_rotate %7 by %c255_i32 dim 1 : vector<32x256xf32>, i32 -> vector<32x256xf32>
    %cst_10 = arith.constant 0.000000e+00 : f32
    %20 = vector.shape_cast %18 : vector<1x256xi1> to vector<1x256xi1>
    %21 = vector.broadcast %20 : vector<1x256xi1> to vector<32x256xi1>
    %22 = vector.broadcast %cst_10 : f32 to vector<32x256xf32>
    %23 = arith.select %21, %19, %22 : vector<32x256xi1>, vector<32x256xf32>
    %24 = arith.truncf %23 : vector<32x256xf32> to vector<32x256xbf16>
    %25 = tpu.concatenate %16, %8, %24 in 0 : vector<32x256xbf16>, vector<32x256xbf16>, vector<32x256xbf16> -> vector<96x256xbf16>
    %c0_11 = arith.constant 0 : index
    %c0_12 = arith.constant 0 : index
    %c0_13 = arith.constant 0 : index
    %26 = vector.load %arg5[%c0_11, %c0_12, %c0_13] : memref<4x32x96xbf16, #tpu.memory_space<vmem>>, vector<1x32x96xbf16>
    %27 = vector.shape_cast %26 : vector<1x32x96xbf16> to vector<32x96xbf16>
    %cst_14 = arith.constant dense<0.000000e+00> : vector<32x256xf32>
    %28 = tpu.matmul %27, %25, %cst_14 {dimension_numbers = #tpu.dot_dimension_numbers<[1], [0], [0], [1], [0, 0, 1, 1], [], []>} : vector<32x96xbf16>, vector<96x256xbf16>, vector<32x256xf32> -> vector<32x256xf32>
    %c0_15 = arith.constant 0 : index
    %c0_16 = arith.constant 0 : index
    %c0_17 = arith.constant 0 : index
    %29 = vector.load %arg6[%c0_15, %c0_16, %c0_17] : memref<4x32x1xf32, #tpu.memory_space<vmem>>, vector<1x32x1xf32>
    %30 = vector.shape_cast %29 : vector<1x32x1xf32> to vector<32x1xf32>
    %31 = vector.broadcast %30 : vector<32x1xf32> to vector<32x256xf32>
    %32 = arith.addf %28, %31 : vector<32x256xf32>
    %cst_18 = arith.constant 0.000000e+00 : f32
    %33 = vector.broadcast %cst_18 : f32 to vector<32x256xf32>
    %34 = arith.maximumf %32, %33 : vector<32x256xf32>
    %c0_19 = arith.constant 0 : index
    %c0_20 = arith.constant 0 : index
    %c0_21 = arith.constant 0 : index
    %35 = vector.load %arg7[%c0_19, %c0_20, %c0_21] : memref<4x32x32xbf16, #tpu.memory_space<vmem>>, vector<1x32x32xbf16>
    %36 = vector.shape_cast %35 : vector<1x32x32xbf16> to vector<32x32xbf16>
    %37 = arith.truncf %34 : vector<32x256xf32> to vector<32x256xbf16>
    %cst_22 = arith.constant dense<0.000000e+00> : vector<32x256xf32>
    %38 = tpu.matmul %36, %37, %cst_22 {dimension_numbers = #tpu.dot_dimension_numbers<[1], [0], [0], [1], [0, 0, 1, 1], [], []>} : vector<32x32xbf16>, vector<32x256xbf16>, vector<32x256xf32> -> vector<32x256xf32>
    %c0_23 = arith.constant 0 : index
    %c0_24 = arith.constant 0 : index
    %c0_25 = arith.constant 0 : index
    %39 = vector.load %arg8[%c0_23, %c0_24, %c0_25] : memref<4x32x1xf32, #tpu.memory_space<vmem>>, vector<1x32x1xf32>
    %40 = vector.shape_cast %39 : vector<1x32x1xf32> to vector<32x1xf32>
    %41 = vector.broadcast %40 : vector<32x1xf32> to vector<32x256xf32>
    %42 = arith.addf %38, %41 : vector<32x256xf32>
    %43 = arith.addf %7, %42 : vector<32x256xf32>
    %44 = arith.truncf %43 : vector<32x256xf32> to vector<32x256xbf16>
    %c2_i32 = arith.constant 2 : i32
    %45 = vector.broadcast %c2_i32 : i32 to vector<1x256xi32>
    %46 = arith.cmpi sge, %0, %45 : vector<1x256xi32>
    %c2_i32_26 = arith.constant 2 : i32
    %47 = tpu.dynamic_rotate %43 by %c2_i32_26 dim 1 : vector<32x256xf32>, i32 -> vector<32x256xf32>
    %cst_27 = arith.constant 0.000000e+00 : f32
    %48 = vector.shape_cast %46 : vector<1x256xi1> to vector<1x256xi1>
    %49 = vector.broadcast %48 : vector<1x256xi1> to vector<32x256xi1>
    %50 = vector.broadcast %cst_27 : f32 to vector<32x256xf32>
    %51 = arith.select %49, %47, %50 : vector<32x256xi1>, vector<32x256xf32>
    %52 = arith.truncf %51 : vector<32x256xf32> to vector<32x256xbf16>
    %c126_i32 = arith.constant 126 : i32
    %53 = vector.broadcast %c126_i32 : i32 to vector<1x256xi32>
    %54 = arith.cmpi slt, %0, %53 : vector<1x256xi32>
    %c254_i32 = arith.constant 254 : i32
    %55 = tpu.dynamic_rotate %43 by %c254_i32 dim 1 : vector<32x256xf32>, i32 -> vector<32x256xf32>
    %cst_28 = arith.constant 0.000000e+00 : f32
    %56 = vector.shape_cast %54 : vector<1x256xi1> to vector<1x256xi1>
    %57 = vector.broadcast %56 : vector<1x256xi1> to vector<32x256xi1>
    %58 = vector.broadcast %cst_28 : f32 to vector<32x256xf32>
    %59 = arith.select %57, %55, %58 : vector<32x256xi1>, vector<32x256xf32>
    %60 = arith.truncf %59 : vector<32x256xf32> to vector<32x256xbf16>
    %61 = tpu.concatenate %52, %44, %60 in 0 : vector<32x256xbf16>, vector<32x256xbf16>, vector<32x256xbf16> -> vector<96x256xbf16>
    %c1 = arith.constant 1 : index
    %c0_29 = arith.constant 0 : index
    %c0_30 = arith.constant 0 : index
    %62 = vector.load %arg5[%c1, %c0_29, %c0_30] : memref<4x32x96xbf16, #tpu.memory_space<vmem>>, vector<1x32x96xbf16>
    %63 = vector.shape_cast %62 : vector<1x32x96xbf16> to vector<32x96xbf16>
    %cst_31 = arith.constant dense<0.000000e+00> : vector<32x256xf32>
    %64 = tpu.matmul %63, %61, %cst_31 {dimension_numbers = #tpu.dot_dimension_numbers<[1], [0], [0], [1], [0, 0, 1, 1], [], []>} : vector<32x96xbf16>, vector<96x256xbf16>, vector<32x256xf32> -> vector<32x256xf32>
    %c1_32 = arith.constant 1 : index
    %c0_33 = arith.constant 0 : index
    %c0_34 = arith.constant 0 : index
    %65 = vector.load %arg6[%c1_32, %c0_33, %c0_34] : memref<4x32x1xf32, #tpu.memory_space<vmem>>, vector<1x32x1xf32>
    %66 = vector.shape_cast %65 : vector<1x32x1xf32> to vector<32x1xf32>
    %67 = vector.broadcast %66 : vector<32x1xf32> to vector<32x256xf32>
    %68 = arith.addf %64, %67 : vector<32x256xf32>
    %cst_35 = arith.constant 0.000000e+00 : f32
    %69 = vector.broadcast %cst_35 : f32 to vector<32x256xf32>
    %70 = arith.maximumf %68, %69 : vector<32x256xf32>
    %c1_36 = arith.constant 1 : index
    %c0_37 = arith.constant 0 : index
    %c0_38 = arith.constant 0 : index
    %71 = vector.load %arg7[%c1_36, %c0_37, %c0_38] : memref<4x32x32xbf16, #tpu.memory_space<vmem>>, vector<1x32x32xbf16>
    %72 = vector.shape_cast %71 : vector<1x32x32xbf16> to vector<32x32xbf16>
    %73 = arith.truncf %70 : vector<32x256xf32> to vector<32x256xbf16>
    %cst_39 = arith.constant dense<0.000000e+00> : vector<32x256xf32>
    %74 = tpu.matmul %72, %73, %cst_39 {dimension_numbers = #tpu.dot_dimension_numbers<[1], [0], [0], [1], [0, 0, 1, 1], [], []>} : vector<32x32xbf16>, vector<32x256xbf16>, vector<32x256xf32> -> vector<32x256xf32>
    %c1_40 = arith.constant 1 : index
    %c0_41 = arith.constant 0 : index
    %c0_42 = arith.constant 0 : index
    %75 = vector.load %arg8[%c1_40, %c0_41, %c0_42] : memref<4x32x1xf32, #tpu.memory_space<vmem>>, vector<1x32x1xf32>
    %76 = vector.shape_cast %75 : vector<1x32x1xf32> to vector<32x1xf32>
    %77 = vector.broadcast %76 : vector<32x1xf32> to vector<32x256xf32>
    %78 = arith.addf %74, %77 : vector<32x256xf32>
    %79 = arith.addf %43, %78 : vector<32x256xf32>
    %80 = arith.truncf %79 : vector<32x256xf32> to vector<32x256xbf16>
    %c4_i32 = arith.constant 4 : i32
    %81 = vector.broadcast %c4_i32 : i32 to vector<1x256xi32>
    %82 = arith.cmpi sge, %0, %81 : vector<1x256xi32>
    %c4_i32_43 = arith.constant 4 : i32
    %83 = tpu.dynamic_rotate %79 by %c4_i32_43 dim 1 : vector<32x256xf32>, i32 -> vector<32x256xf32>
    %cst_44 = arith.constant 0.000000e+00 : f32
    %84 = vector.shape_cast %82 : vector<1x256xi1> to vector<1x256xi1>
    %85 = vector.broadcast %84 : vector<1x256xi1> to vector<32x256xi1>
    %86 = vector.broadcast %cst_44 : f32 to vector<32x256xf32>
    %87 = arith.select %85, %83, %86 : vector<32x256xi1>, vector<32x256xf32>
    %88 = arith.truncf %87 : vector<32x256xf32> to vector<32x256xbf16>
    %c124_i32 = arith.constant 124 : i32
    %89 = vector.broadcast %c124_i32 : i32 to vector<1x256xi32>
    %90 = arith.cmpi slt, %0, %89 : vector<1x256xi32>
    %c252_i32 = arith.constant 252 : i32
    %91 = tpu.dynamic_rotate %79 by %c252_i32 dim 1 : vector<32x256xf32>, i32 -> vector<32x256xf32>
    %cst_45 = arith.constant 0.000000e+00 : f32
    %92 = vector.shape_cast %90 : vector<1x256xi1> to vector<1x256xi1>
    %93 = vector.broadcast %92 : vector<1x256xi1> to vector<32x256xi1>
    %94 = vector.broadcast %cst_45 : f32 to vector<32x256xf32>
    %95 = arith.select %93, %91, %94 : vector<32x256xi1>, vector<32x256xf32>
    %96 = arith.truncf %95 : vector<32x256xf32> to vector<32x256xbf16>
    %97 = tpu.concatenate %88, %80, %96 in 0 : vector<32x256xbf16>, vector<32x256xbf16>, vector<32x256xbf16> -> vector<96x256xbf16>
    %c2 = arith.constant 2 : index
    %c0_46 = arith.constant 0 : index
    %c0_47 = arith.constant 0 : index
    %98 = vector.load %arg5[%c2, %c0_46, %c0_47] : memref<4x32x96xbf16, #tpu.memory_space<vmem>>, vector<1x32x96xbf16>
    %99 = vector.shape_cast %98 : vector<1x32x96xbf16> to vector<32x96xbf16>
    %cst_48 = arith.constant dense<0.000000e+00> : vector<32x256xf32>
    %100 = tpu.matmul %99, %97, %cst_48 {dimension_numbers = #tpu.dot_dimension_numbers<[1], [0], [0], [1], [0, 0, 1, 1], [], []>} : vector<32x96xbf16>, vector<96x256xbf16>, vector<32x256xf32> -> vector<32x256xf32>
    %c2_49 = arith.constant 2 : index
    %c0_50 = arith.constant 0 : index
    %c0_51 = arith.constant 0 : index
    %101 = vector.load %arg6[%c2_49, %c0_50, %c0_51] : memref<4x32x1xf32, #tpu.memory_space<vmem>>, vector<1x32x1xf32>
    %102 = vector.shape_cast %101 : vector<1x32x1xf32> to vector<32x1xf32>
    %103 = vector.broadcast %102 : vector<32x1xf32> to vector<32x256xf32>
    %104 = arith.addf %100, %103 : vector<32x256xf32>
    %cst_52 = arith.constant 0.000000e+00 : f32
    %105 = vector.broadcast %cst_52 : f32 to vector<32x256xf32>
    %106 = arith.maximumf %104, %105 : vector<32x256xf32>
    %c2_53 = arith.constant 2 : index
    %c0_54 = arith.constant 0 : index
    %c0_55 = arith.constant 0 : index
    %107 = vector.load %arg7[%c2_53, %c0_54, %c0_55] : memref<4x32x32xbf16, #tpu.memory_space<vmem>>, vector<1x32x32xbf16>
    %108 = vector.shape_cast %107 : vector<1x32x32xbf16> to vector<32x32xbf16>
    %109 = arith.truncf %106 : vector<32x256xf32> to vector<32x256xbf16>
    %cst_56 = arith.constant dense<0.000000e+00> : vector<32x256xf32>
    %110 = tpu.matmul %108, %109, %cst_56 {dimension_numbers = #tpu.dot_dimension_numbers<[1], [0], [0], [1], [0, 0, 1, 1], [], []>} : vector<32x32xbf16>, vector<32x256xbf16>, vector<32x256xf32> -> vector<32x256xf32>
    %c2_57 = arith.constant 2 : index
    %c0_58 = arith.constant 0 : index
    %c0_59 = arith.constant 0 : index
    %111 = vector.load %arg8[%c2_57, %c0_58, %c0_59] : memref<4x32x1xf32, #tpu.memory_space<vmem>>, vector<1x32x1xf32>
    %112 = vector.shape_cast %111 : vector<1x32x1xf32> to vector<32x1xf32>
    %113 = vector.broadcast %112 : vector<32x1xf32> to vector<32x256xf32>
    %114 = arith.addf %110, %113 : vector<32x256xf32>
    %115 = arith.addf %79, %114 : vector<32x256xf32>
    %116 = arith.truncf %115 : vector<32x256xf32> to vector<32x256xbf16>
    %c8_i32 = arith.constant 8 : i32
    %117 = vector.broadcast %c8_i32 : i32 to vector<1x256xi32>
    %118 = arith.cmpi sge, %0, %117 : vector<1x256xi32>
    %c8_i32_60 = arith.constant 8 : i32
    %119 = tpu.dynamic_rotate %115 by %c8_i32_60 dim 1 : vector<32x256xf32>, i32 -> vector<32x256xf32>
    %cst_61 = arith.constant 0.000000e+00 : f32
    %120 = vector.shape_cast %118 : vector<1x256xi1> to vector<1x256xi1>
    %121 = vector.broadcast %120 : vector<1x256xi1> to vector<32x256xi1>
    %122 = vector.broadcast %cst_61 : f32 to vector<32x256xf32>
    %123 = arith.select %121, %119, %122 : vector<32x256xi1>, vector<32x256xf32>
    %124 = arith.truncf %123 : vector<32x256xf32> to vector<32x256xbf16>
    %c120_i32 = arith.constant 120 : i32
    %125 = vector.broadcast %c120_i32 : i32 to vector<1x256xi32>
    %126 = arith.cmpi slt, %0, %125 : vector<1x256xi32>
    %c248_i32 = arith.constant 248 : i32
    %127 = tpu.dynamic_rotate %115 by %c248_i32 dim 1 : vector<32x256xf32>, i32 -> vector<32x256xf32>
    %cst_62 = arith.constant 0.000000e+00 : f32
    %128 = vector.shape_cast %126 : vector<1x256xi1> to vector<1x256xi1>
    %129 = vector.broadcast %128 : vector<1x256xi1> to vector<32x256xi1>
    %130 = vector.broadcast %cst_62 : f32 to vector<32x256xf32>
    %131 = arith.select %129, %127, %130 : vector<32x256xi1>, vector<32x256xf32>
    %132 = arith.truncf %131 : vector<32x256xf32> to vector<32x256xbf16>
    %133 = tpu.concatenate %124, %116, %132 in 0 : vector<32x256xbf16>, vector<32x256xbf16>, vector<32x256xbf16> -> vector<96x256xbf16>
    %c3 = arith.constant 3 : index
    %c0_63 = arith.constant 0 : index
    %c0_64 = arith.constant 0 : index
    %134 = vector.load %arg5[%c3, %c0_63, %c0_64] : memref<4x32x96xbf16, #tpu.memory_space<vmem>>, vector<1x32x96xbf16>
    %135 = vector.shape_cast %134 : vector<1x32x96xbf16> to vector<32x96xbf16>
    %cst_65 = arith.constant dense<0.000000e+00> : vector<32x256xf32>
    %136 = tpu.matmul %135, %133, %cst_65 {dimension_numbers = #tpu.dot_dimension_numbers<[1], [0], [0], [1], [0, 0, 1, 1], [], []>} : vector<32x96xbf16>, vector<96x256xbf16>, vector<32x256xf32> -> vector<32x256xf32>
    %c3_66 = arith.constant 3 : index
    %c0_67 = arith.constant 0 : index
    %c0_68 = arith.constant 0 : index
    %137 = vector.load %arg6[%c3_66, %c0_67, %c0_68] : memref<4x32x1xf32, #tpu.memory_space<vmem>>, vector<1x32x1xf32>
    %138 = vector.shape_cast %137 : vector<1x32x1xf32> to vector<32x1xf32>
    %139 = vector.broadcast %138 : vector<32x1xf32> to vector<32x256xf32>
    %140 = arith.addf %136, %139 : vector<32x256xf32>
    %cst_69 = arith.constant 0.000000e+00 : f32
    %141 = vector.broadcast %cst_69 : f32 to vector<32x256xf32>
    %142 = arith.maximumf %140, %141 : vector<32x256xf32>
    %c3_70 = arith.constant 3 : index
    %c0_71 = arith.constant 0 : index
    %c0_72 = arith.constant 0 : index
    %143 = vector.load %arg7[%c3_70, %c0_71, %c0_72] : memref<4x32x32xbf16, #tpu.memory_space<vmem>>, vector<1x32x32xbf16>
    %144 = vector.shape_cast %143 : vector<1x32x32xbf16> to vector<32x32xbf16>
    %145 = arith.truncf %142 : vector<32x256xf32> to vector<32x256xbf16>
    %cst_73 = arith.constant dense<0.000000e+00> : vector<32x256xf32>
    %146 = tpu.matmul %144, %145, %cst_73 {dimension_numbers = #tpu.dot_dimension_numbers<[1], [0], [0], [1], [0, 0, 1, 1], [], []>} : vector<32x32xbf16>, vector<32x256xbf16>, vector<32x256xf32> -> vector<32x256xf32>
    %c3_74 = arith.constant 3 : index
    %c0_75 = arith.constant 0 : index
    %c0_76 = arith.constant 0 : index
    %147 = vector.load %arg8[%c3_74, %c0_75, %c0_76] : memref<4x32x1xf32, #tpu.memory_space<vmem>>, vector<1x32x1xf32>
    %148 = vector.shape_cast %147 : vector<1x32x1xf32> to vector<32x1xf32>
    %149 = vector.broadcast %148 : vector<32x1xf32> to vector<32x256xf32>
    %150 = arith.addf %146, %149 : vector<32x256xf32>
    %151 = arith.addf %115, %150 : vector<32x256xf32>
    %c0_77 = arith.constant 0 : index
    %c0_78 = arith.constant 0 : index
    %152 = vector.load %arg9[%c0_77, %c0_78] : memref<16x32xbf16, #tpu.memory_space<vmem>>, vector<16x32xbf16>
    %153 = arith.truncf %151 : vector<32x256xf32> to vector<32x256xbf16>
    %cst_79 = arith.constant dense<0.000000e+00> : vector<16x256xf32>
    %154 = tpu.matmul %152, %153, %cst_79 {dimension_numbers = #tpu.dot_dimension_numbers<[1], [0], [0], [1], [0, 0, 1, 1], [], []>} : vector<16x32xbf16>, vector<32x256xbf16>, vector<16x256xf32> -> vector<16x256xf32>
    %c0_80 = arith.constant 0 : index
    %c0_81 = arith.constant 0 : index
    %155 = vector.load %arg10[%c0_80, %c0_81] : memref<16x1xf32, #tpu.memory_space<vmem>>, vector<16x1xf32>
    %156 = vector.broadcast %155 : vector<16x1xf32> to vector<16x256xf32>
    %157 = arith.addf %154, %156 : vector<16x256xf32>
    %c0_82 = arith.constant 0 : index
    %c0_83 = arith.constant 0 : index
    %c0_84 = arith.constant 0 : index
    %158 = vector.load %arg11[%c0_82, %c0_83, %c0_84] : memref<1x16x256xf32, #tpu.memory_space<vmem>>, vector<1x16x256xf32>
    %159 = vector.shape_cast %158 : vector<1x16x256xf32> to vector<16x256xf32>
    %160 = vector.shape_cast %157 : vector<16x256xf32> to vector<1x16x256xf32>
    tpu.vector_store %arg11[%c0_82, %c0_83, %c0_84], %160 {strides = array<i32>} : memref<1x16x256xf32, #tpu.memory_space<vmem>>, vector<1x16x256xf32>,
    return
  }
  func.func @transform_0(%arg0: i32) -> (i32, i32) {
    %c0_i32 = arith.constant 0 : i32
    %c0_i32_0 = arith.constant 0 : i32
    %c0_i32_1 = arith.constant 0 : i32
    return %c0_i32, %c0_i32_0 : i32, i32
  }
  func.func @transform_1(%arg0: i32) -> (i32, i32, i32) {
    %c0_i32 = arith.constant 0 : i32
    %c0_i32_0 = arith.constant 0 : i32
    %c0_i32_1 = arith.constant 0 : i32
    return %arg0, %c0_i32, %c0_i32_0 : i32, i32, i32
  }
  func.func @transform_2(%arg0: i32) -> (i32, i32) {
    %c0_i32 = arith.constant 0 : i32
    %c0_i32_0 = arith.constant 0 : i32
    %c0_i32_1 = arith.constant 0 : i32
    return %c0_i32, %c0_i32_0 : i32, i32
  }
  func.func @transform_3(%arg0: i32) -> (i32, i32) {
    %c0_i32 = arith.constant 0 : i32
    %c0_i32_0 = arith.constant 0 : i32
    %c0_i32_1 = arith.constant 0 : i32
    return %c0_i32, %c0_i32_0 : i32, i32
  }
  func.func @transform_4(%arg0: i32) -> (i32, i32, i32) {
    %c0_i32 = arith.constant 0 : i32
    %c0_i32_0 = arith.constant 0 : i32
    %c0_i32_1 = arith.constant 0 : i32
    %c0_i32_2 = arith.constant 0 : i32
    return %c0_i32, %c0_i32_0, %c0_i32_1 : i32, i32, i32
  }
  func.func @transform_5(%arg0: i32) -> (i32, i32, i32) {
    %c0_i32 = arith.constant 0 : i32
    %c0_i32_0 = arith.constant 0 : i32
    %c0_i32_1 = arith.constant 0 : i32
    %c0_i32_2 = arith.constant 0 : i32
    return %c0_i32, %c0_i32_0, %c0_i32_1 : i32, i32, i32
  }
  func.func @transform_6(%arg0: i32) -> (i32, i32, i32) {
    %c0_i32 = arith.constant 0 : i32
    %c0_i32_0 = arith.constant 0 : i32
    %c0_i32_1 = arith.constant 0 : i32
    %c0_i32_2 = arith.constant 0 : i32
    return %c0_i32, %c0_i32_0, %c0_i32_1 : i32, i32, i32
  }
  func.func @transform_7(%arg0: i32) -> (i32, i32, i32) {
    %c0_i32 = arith.constant 0 : i32
    %c0_i32_0 = arith.constant 0 : i32
    %c0_i32_1 = arith.constant 0 : i32
    %c0_i32_2 = arith.constant 0 : i32
    return %c0_i32, %c0_i32_0, %c0_i32_1 : i32, i32, i32
  }
  func.func @transform_8(%arg0: i32) -> (i32, i32) {
    %c0_i32 = arith.constant 0 : i32
    %c0_i32_0 = arith.constant 0 : i32
    %c0_i32_1 = arith.constant 0 : i32
    return %c0_i32, %c0_i32_0 : i32, i32
  }
  func.func @transform_9(%arg0: i32) -> (i32, i32) {
    %c0_i32 = arith.constant 0 : i32
    %c0_i32_0 = arith.constant 0 : i32
    %c0_i32_1 = arith.constant 0 : i32
    return %c0_i32, %c0_i32_0 : i32, i32
  }
  func.func @transform_10(%arg0: i32) -> (i32, i32, i32) {
    %c0_i32 = arith.constant 0 : i32
    %c0_i32_0 = arith.constant 0 : i32
    %c0_i32_1 = arith.constant 0 : i32
    return %arg0, %c0_i32, %c0_i32_0 : i32, i32, i32
  }
}

</mosaic_0001>

<bundles_post_ra>
// kernel: tpu_custom_call.1
= control target key start
LH: loop header
LB: loop body
LE: loop exit
PB: predicated region body
PF: predicated region fallthrough
CT: control target
= control target key end

     0   :  { %v1922_v2 = vmov 0   ;;  %vm88_vm0 = vcmask 130048   ;;  %s2748_s0 = inlined_call_operand.vmem [shape: s32[1,256], index: 0, kind: input, shape index: {}]   ;;  %s2749_s1 = inlined_call_operand.vmem [shape: bf16[1,16,256], index: 1, kind: input, shape index: {}]   ;;  %s2750_s2 = inlined_call_operand.vmem [shape: bf16[32,16], index: 2, kind: input, shape index: {}]   ;;  %s2751_s3 = inlined_call_operand.vmem [shape: f32[32,1], index: 3, kind: input, shape index: {}]   ;;  %s2752_s4 = inlined_call_operand.vmem [shape: bf16[4,32,96], index: 4, kind: input, shape index: {}]   ;;  %s2753_s5 = inlined_call_operand.vmem [shape: f32[4,32,1], index: 5, kind: input, shape index: {}]   ;;  %s2754_s6 = inlined_call_operand.vmem [shape: bf16[4,32,32], index: 6, kind: input, shape index: {}]   ;;  %s2755_s7 = inlined_call_operand.vmem [shape: f32[4,32,1], index: 7, kind: input, shape index: {}]   ;;  %s2756_s8 = inlined_call_operand.vmem [shape: bf16[16,32], index: 8, kind: input, shape index: {}]   ;;  %s2757_s9 = inlined_call_operand.vmem [shape: f32[16,1], index: 9, kind: input, shape index: {}]   ;;  %s2758_s10 = inlined_call_operand.hbm [shape: f32[1,16,256], index: 10, kind: output, shape index: {}]  }
   0x1   :  { %v1875_v0 = vld [vmem:[%s2749_s1 + $0x4] ss:$8 sps:$4 sm:$0xff]   ;;  %v1877_v1 = vld [vmem:[%s2749_s1] ss:$8 sps:$4 sm:$0xff]   ;;  %127 = vmatprep.mubr.bf16.mxu0 %v1922_v2  ;;  %1713 = vset.pattern.permute.xlu0 %v1922_v2  ;;  %v46_v6 = vld [vmem:[%s2751_s3 + $0x10] sm:$0xff] }
   0x2   :  { %95 = vmatprep.subr.bf16.mxu0 %v1875_v0  ;;  %v1878_v3 = vld [vmem:[%s2750_s2] sm:$0xff]   ;;  %1714 = vset.pattern.permute.xlu1 %v1922_v2  ;;  %v45_v5 = vld [vmem:[%s2751_s3 + $0x8] sm:$0xff]  ;;  %v47_v7 = vld [vmem:[%s2751_s3 + $0x18] sm:$0xff] }
   0x3   :  { %96 = vmatpush1.bf16.msra.mxu0 %v1877_v1  ;;  %v44_v4 = vld [vmem:[%s2751_s3] sm:$0xff]  ;;  %329 = vmatprep.mubr.bf16.mxu1 %v1922_v2  ;;  %v1879_v8 = vld [vmem:[%s2750_s2 + $0x8] sm:$0xff]  }
   0x4   :  { %50 = vperm.xlu0 %1713, %v44_v4   ;;  %60 = vperm.xlu1 %1714, %v46_v6  }
   0x6   :  { %1521 = vmatmul.mubr.msk.bf16.vlgmr.msra.gmra.mrb[0].mxu0 %vm88_vm0, %v1878_v3 }
   0x7   :  { %137 = vmatprep.mubr.bf16.mxu0 %v1922_v2 }
   0x8   :  { %55 = vperm.xlu0 %1713, %v45_v5   ;;  %65 = vperm.xlu1 %1714, %v47_v7  }
   0xe   :  { %1522 = vmatmul.mubr.msk.bf16.gmra.mrb[4].mxu0 %vm88_vm0, %v1879_v8 }
   0xf   :  { %439 = vmatprep.mubr.bf16.mxu0 %v1922_v2 }
  0x10   :  { %15 = vsyncpa [#allocation3], 0  ;;  %s1923_s2 = smov 1   ;;  %s1924_s3 = smov 127   ;;  %v256_v33 = vld [vmem:[%s2753_s5] sm:$0xff]  ;;  %v257_v34 = vld [vmem:[%s2753_s5 + $0x8] sm:$0xff]  ;;  %v169_v41 = vlaneseq }
  0x11   :  { %v258_v35 = vld [vmem:[%s2753_s5 + $0x10] sm:$0xff]  ;;  %v259_v36 = vld [vmem:[%s2753_s5 + $0x18] sm:$0xff]  ;;  %v366_v37 = vld [vmem:[%s2755_s7] sm:$0xff]  ;;  %vm290_vm13 = vcmask 785408   ;;  %vm400_vm14 = vcmask 261120   ;;  %s1925_s11 = smov 2  }
  0x12   :  { %v367_v38 = vld [vmem:[%s2755_s7 + $0x8] sm:$0xff]  ;;  %v368_v39 = vld [vmem:[%s2755_s7 + $0x10] sm:$0xff]  ;;  %v369_v40 = vld [vmem:[%s2755_s7 + $0x18] sm:$0xff]  ;;  %v182_v43 = vshrl.u32 %v169_v41, 7  ;;  %v2078_v47 = vand.u32 127, %v169_v41  ;;  %s1926_s12 = smov 126  }
  0x13   :  { %v2070_v42 = vld [vmem:[%s2748_s0] sm:$0x3]  ;;  %s1927_s14 = smov 4   ;;  %s1928_s15 = smov 124  }
  0x14   :  { %vm152_vm1 = vcmp.ge.s32.totalorder %v2070_v42, 1  ;;  %v2073_v44 = vsub.s32 1, %v182_v43  ;;  %v2076_v46 = vsub.s32 0, %v182_v43  ;;  %vm171_vm2 = vcmp.lt.s32.totalorder %v2078_v47, 1  ;;  %s1929_s17 = smov 8   ;;  %s1930_s18 = smov 120  }
  0x15   :  { %v180_v45 = vsel %vm152_vm1, 1, %v1922_v2  ;;  %vm203_vm7 = vcmp.lt.s32.totalorder %v2070_v42, 127  ;;  %vm220_vm8 = vcmp.lt.s32.totalorder %v2078_v47, 127  ;;  %vm472_vm15 = vcmp.ge.s32.totalorder %v2070_v42, 2  ;;  %s1931_s1 = smov [#allocation2]  }
  0x16   :  { %v188_v48 = vrot.slane %v180_v45, %v2073_v44  ;;  %v184_v49 = vrot.slane %v180_v45, %v2076_v46  ;;  %v229_v7 = vsel %vm203_vm7, 1, %v1922_v2  ;;  %vm489_vm0 = vcmp.lt.s32.totalorder %v2078_v47, 2  ;;  %s1506_s22 = sshll.u32 %s1931_s1, 4  ;;  %s1507_s22 = int_to_ptr.vmem [resolvable:$true] %s1506_s22 }
  0x17   :  { %p1903_p1 = scmp.lt.s32.totalorder %s1507_s22, %s1507_s22 }
  0x18   :  { %vm2083_vm3 = vcmp.eq.s32.totalorder %v188_v48, 1  ;;  %vm2087_vm4 = vcmp.eq.s32.totalorder %v184_v49, 1 }
  0x19   :  { %vm1525_vm5 = vmpackc.low %vm2083_vm3, %vm2083_vm3 }
  0x1a   :  { %vm1528_vm6 = vmpackc.low %vm2087_vm4, %vm2087_vm4 }
  0x83   :  { %v51_v9 = vpop.permute.xlu0 %50  ;;  %v61_v18 = vpop.permute.xlu1 %60 }
  0x87   :  { %v56_v11 = vpop.permute.xlu0 %55  ;;  %v66_v24 = vpop.permute.xlu1 %65 }
  0xd9   :  { %v129_v10 = vpop.f32.mrb[0].mxu0 }
  0xda   :  { %v131_v12 = vpop.f32.mrb[1].mxu0  ;;  %v2019_v14 = vadd.f32 %v129_v10, %v51_v9 }
  0xdb   :  { %v133_v13 = vpop.f32.mrb[2].mxu0  ;;  %v2023_v17 = vadd.f32 %v131_v12, %v51_v9 }
  0xdc   :  { %v2021_v15 = vadd.f32 %v133_v13, %v56_v11  ;;  %v135_v16 = vpop.f32.mrb[3].mxu0 }
  0xdd   :  { %v2025_v19 = vadd.f32 %v135_v16, %v56_v11 }
  0xde   :  { %v1715_v20 = vpack.i.bf16 %v2021_v15, %v2019_v14 }
  0xdf   :  { %v1720_v21 = vpack.i.bf16 %v2025_v19, %v2023_v17 }
  0xe0   :  { %1716 = vrot.lane.b32.xlu0 %v1715_v20, %s1923_s2 }
  0xe1   :  { %v139_v22 = vpop.f32.mrb[4].mxu0  ;;  %1721 = vrot.lane.b32.xlu1 %v1720_v21, %s1923_s2 }
  0xe2   :  { %v141_v23 = vpop.f32.mrb[5].mxu0  ;;  %v2031_v26 = vadd.f32 %v139_v22, %v61_v18 }
  0xe3   :  { %v143_v25 = vpop.f32.mrb[6].mxu0  ;;  %v2035_v29 = vadd.f32 %v141_v23, %v61_v18 }
  0xe4   :  { %v2033_v27 = vadd.f32 %v143_v25, %v66_v24  ;;  %v145_v28 = vpop.f32.mrb[7].mxu0 }
  0xe5   :  { %v2037_v30 = vadd.f32 %v145_v28, %v66_v24 }
  0xe6   :  { %v1725_v31 = vpack.i.bf16 %v2033_v27, %v2031_v26  ;;  %v150_v43 = vpack.c.bf16 %v2033_v27, %v2031_v26 }
  0xe7   :  { %v1730_v32 = vpack.i.bf16 %v2037_v30, %v2035_v29 }
  0xe8   :  { %1726 = vrot.lane.b32.xlu0 %v1725_v31, %s1923_s2 }
  0xe9   :  { %1731 = vrot.lane.b32.xlu1 %v1730_v32, %s1923_s2 }
  0xec   :  { %1736 = vrot.lane.b32.xlu0 %v1715_v20, %s1924_s3  ;;  %v149_v20 = vpack.c.bf16 %v2025_v19, %v2023_v17 }
  0xed   :  { %1741 = vrot.lane.b32.xlu1 %v1720_v21, %s1924_s3  ;;  %v237_v21 = vrot.slane %v229_v7, %v2073_v44 }
  0xef   :  { %vm2148_vm9 = vcmp.eq.s32.totalorder %v237_v21, 1 }
  0xf0   :  { %1746 = vrot.lane.b32.xlu0 %v1725_v31, %s1924_s3  ;;  %vm1537_vm10 = vmpackc.low %vm2148_vm9, %vm2148_vm9 }
  0xf1   :  { %1751 = vrot.lane.b32.xlu1 %v1730_v32, %s1924_s3  ;;  %v148_v32 = vpack.c.bf16 %v2021_v15, %v2019_v14 }
  0xf4   :  { %262 = vperm.xlu0 %1713, %v256_v33   ;;  %v233_v33 = vrot.slane %v229_v7, %v2076_v46 }
  0xf5   :  { %267 = vperm.xlu1 %1714, %v257_v34  }
  0xf6   :  { %vm2157_vm11 = vcmp.eq.s32.totalorder %v233_v33, 1 }
  0xf7   :  { %vm1540_vm12 = vmpackc.low %vm2157_vm11, %vm2157_vm11  ;;  %vm792_vm11 = vcmp.ge.s32.totalorder %v2070_v42, 4 }
  0xf8   :  { %272 = vperm.xlu0 %1713, %v258_v35  }
  0xf9   :  { %277 = vperm.xlu1 %1714, %v259_v36   ;;  %v151_v36 = vpack.c.bf16 %v2037_v30, %v2035_v29 }
  0xfc   :  { %372 = vperm.xlu0 %1713, %v366_v37   ;;  %v1882_v37 = vld [vmem:[%s2754_s6] sm:$0xff]  }
  0xfd   :  { %377 = vperm.xlu1 %1714, %v367_v38  }
 0x100   :  { %382 = vperm.xlu0 %1713, %v368_v39  }
 0x101   :  { %387 = vperm.xlu1 %1714, %v369_v40  }
 0x152   :  { %v1717_v50 = vpop.permute.xlu0 %1716 }
 0x153   :  { %v1719_v51 = vunpack.i.h.bf16 %v1717_v50  ;;  %v1718_v52 = vunpack.i.l.bf16 %v1717_v50  ;;  %v1722_v53 = vpop.permute.xlu1 %1721 }
 0x154   :  { %v1724_v55 = vunpack.i.h.bf16 %v1722_v53  ;;  %v1723_v56 = vunpack.i.l.bf16 %v1722_v53 }
 0x156   :  { %v172_v58 = vsel %vm171_vm2, %v1718_v52, %v1723_v56  ;;  %v173_v59 = vsel %vm171_vm2, %v1719_v51, %v1724_v55  ;;  %v176_v60 = vsel %vm171_vm2, %v1723_v56, %v1718_v52  ;;  %v177_v61 = vsel %vm171_vm2, %v1724_v55, %v1719_v51 }
 0x157   :  { %v1526_v62 = vpack.c.bf16 %v173_v59, %v172_v58  ;;  %v1529_v63 = vpack.c.bf16 %v177_v61, %v176_v60  ;;  %v1880_v58 = vld [vmem:[%s2752_s4] sm:$0xff]   ;;  %v1881_v59 = vld [vmem:[%s2752_s4 + $0x8] sm:$0xff]  }
 0x159   :  { %1527 = vmatprep.subr.msk.bf16.mxu1 %vm1525_vm5, %v1526_v62 }
 0x15a   :  { %v1727_v0 = vpop.permute.xlu0 %1726  ;;  %1530 = vmatpush1.bf16.msk.msra.mxu1 %vm1528_vm6, %v1529_v63 }
 0x15b   :  { %v1729_v1 = vunpack.i.h.bf16 %v1727_v0  ;;  %v1728_v3 = vunpack.i.l.bf16 %v1727_v0  ;;  %v1732_v4 = vpop.permute.xlu1 %1731 }
 0x15c   :  { %v1734_v5 = vunpack.i.h.bf16 %v1732_v4  ;;  %v1733_v6 = vunpack.i.l.bf16 %v1732_v4 }
 0x15e   :  { %v174_v8 = vsel %vm171_vm2, %v1728_v3, %v1733_v6  ;;  %v175_v9 = vsel %vm171_vm2, %v1729_v1, %v1734_v5  ;;  %v178_v10 = vsel %vm171_vm2, %v1733_v6, %v1728_v3  ;;  %v179_v11 = vsel %vm171_vm2, %v1734_v5, %v1729_v1  ;;  %v1737_v12 = vpop.permute.xlu0 %1736 }
 0x15f   :  { %v1532_v13 = vpack.c.bf16 %v175_v9, %v174_v8  ;;  %v1535_v16 = vpack.c.bf16 %v179_v11, %v178_v10  ;;  %v1742_v18 = vpop.permute.xlu1 %1741  ;;  %v1739_v22 = vunpack.i.h.bf16 %v1737_v12  ;;  %v1738_v23 = vunpack.i.l.bf16 %v1737_v12 }
 0x160   :  { %v1744_v24 = vunpack.i.h.bf16 %v1742_v18  ;;  %v1743_v25 = vunpack.i.l.bf16 %v1742_v18 }
 0x161   :  { %1533 = vmatprep.subr.msk.bf16.mxu1 %vm1525_vm5, %v1532_v13  ;;  %vm521_vm5 = vcmp.lt.s32.totalorder %v2070_v42, 126 }
 0x162   :  { %1536 = vmatpush1.bf16.msk.msra.mxu1 %vm1528_vm6, %v1535_v16  ;;  %v1747_v28 = vpop.permute.xlu0 %1746  ;;  %v225_v34 = vsel %vm220_vm8, %v1743_v25, %v1738_v23  ;;  %v226_v35 = vsel %vm220_vm8, %v1744_v24, %v1739_v22  ;;  %v221_v48 = vsel %vm220_vm8, %v1738_v23, %v1743_v25  ;;  %v222_v49 = vsel %vm220_vm8, %v1739_v22, %v1744_v24 }
 0x163   :  { %v1752_v31 = vpop.permute.xlu1 %1751  ;;  %301 = vmatprep.subr.bf16.mxu1 %v149_v20  ;;  %v1749_v38 = vunpack.i.h.bf16 %v1747_v28  ;;  %v1748_v39 = vunpack.i.l.bf16 %v1747_v28  ;;  %v1538_v50 = vpack.c.bf16 %v226_v35, %v225_v34  ;;  %v1541_v53 = vpack.c.bf16 %v222_v49, %v221_v48 }
 0x164   :  { %v1754_v40 = vunpack.i.h.bf16 %v1752_v31  ;;  %v1753_v41 = vunpack.i.l.bf16 %v1752_v31  ;;  %vm538_vm6 = vcmp.lt.s32.totalorder %v2078_v47, 126 }
 0x166   :  { %302 = vmatpush1.bf16.msra.mxu1 %v148_v32  ;;  %v227_v51 = vsel %vm220_vm8, %v1753_v41, %v1748_v39  ;;  %v228_v52 = vsel %vm220_vm8, %v1754_v40, %v1749_v38  ;;  %v223_v54 = vsel %vm220_vm8, %v1748_v39, %v1753_v41  ;;  %v224_v55 = vsel %vm220_vm8, %v1749_v38, %v1754_v40  ;;  %v1883_v38 = vld [vmem:[%s2754_s6 + $0x8] sm:$0xff]  }
 0x167   :  { %303 = vmatprep.subr.bf16.mxu1 %v151_v36  ;;  %v1544_v56 = vpack.c.bf16 %v228_v52, %v227_v51  ;;  %v1547_v57 = vpack.c.bf16 %v224_v55, %v223_v54 }
 0x16a   :  { %304 = vmatpush1.bf16.msra.mxu1 %v150_v43 }
 0x16b   :  { %1539 = vmatprep.subr.msk.bf16.mxu1 %vm1537_vm10, %v1538_v50 }
 0x16e   :  { %1542 = vmatpush1.bf16.msk.msra.mxu1 %vm1540_vm12, %v1541_v53 }
 0x16f   :  { %1545 = vmatprep.subr.msk.bf16.mxu1 %vm1537_vm10, %v1544_v56 }
 0x172   :  { %1548 = vmatpush1.bf16.msk.msra.mxu1 %vm1540_vm12, %v1547_v57  ;;  %vm809_vm12 = vcmp.lt.s32.totalorder %v2078_v47, 4 }
 0x173   :  { %v263_v60 = vpop.permute.xlu0 %262 }
 0x174   :  { %v268_v0 = vpop.permute.xlu1 %267 }
 0x175   :  { %1549 = vmatmul.mubr.msk.bf16.vlgmr.msra.gmra.mrb[0].mxu1 %vm290_vm13, %v1880_v58 }
 0x176   :  { %339 = vmatprep.mubr.bf16.mxu1 %v1922_v2 }
 0x177   :  { %v273_v12 = vpop.permute.xlu0 %272 }
 0x178   :  { %v278_v21 = vpop.permute.xlu1 %277 }
 0x17b   :  { %v373_v39 = vpop.permute.xlu0 %372 }
 0x17c   :  { %v378_v45 = vpop.permute.xlu1 %377 }
 0x17d   :  { %1550 = vmatmul.mubr.msk.bf16.gmra.mrb[4].mxu1 %vm290_vm13, %v1881_v59 }
 0x17e   :  { %759 = vmatprep.mubr.bf16.mxu1 %v1922_v2 }
 0x17f   :  { %v383_v58 = vpop.permute.xlu0 %382 }
 0x248   :  { %v331_v61 = vpop.f32.mrb[0].mxu1 }
 0x249   :  { %v332_v62 = vadd.f32 %v331_v61, %v263_v60  ;;  %v333_v63 = vpop.f32.mrb[1].mxu1 }
 0x24a   :  { %v334_v1 = vadd.f32 %v333_v63, %v263_v60  ;;  %v335_v3 = vpop.f32.mrb[2].mxu1 }
 0x24b   :  { %v336_v4 = vadd.f32 %v335_v3, %v268_v0  ;;  %v337_v5 = vpop.f32.mrb[3].mxu1  ;;  %v350_v7 = vmax.f32 %v332_v62, 0.0 }
 0x24c   :  { %v338_v6 = vadd.f32 %v337_v5, %v268_v0  ;;  %v351_v9 = vmax.f32 %v334_v1, 0.0 }
 0x24d   :  { %v352_v8 = vmax.f32 %v336_v4, 0.0 }
 0x24e   :  { %v353_v10 = vmax.f32 %v338_v6, 0.0 }
 0x24f   :  { %v362_v11 = vpack.c.bf16 %v352_v8, %v350_v7  ;;  %v1595_v8 = vld [vmem:[%s2755_s7 + $0x20] sm:$0xff] }
 0x250   :  { %v363_v13 = vpack.c.bf16 %v353_v10, %v351_v9  ;;  %v341_v16 = vpop.f32.mrb[4].mxu1  ;;  %v1596_v9 = vld [vmem:[%s2755_s7 + $0x28] sm:$0xff]  ;;  %v1597_v10 = vld [vmem:[%s2755_s7 + $0x30] sm:$0xff] }
 0x251   :  { %v342_v18 = vadd.f32 %v341_v16, %v273_v12  ;;  %v343_v20 = vpop.f32.mrb[5].mxu1 }
 0x252   :  { %v344_v22 = vadd.f32 %v343_v20, %v273_v12  ;;  %v345_v23 = vpop.f32.mrb[6].mxu1  ;;  %407 = vmatprep.subr.bf16.mxu0 %v363_v13  ;;  %v498_v12 = vsel %vm472_vm15, 1, %v1922_v2 }
 0x253   :  { %v346_v24 = vadd.f32 %v345_v23, %v278_v21  ;;  %v347_v25 = vpop.f32.mrb[7].mxu1  ;;  %408 = vmatpush1.bf16.msra.mxu0 %v362_v11  ;;  %v354_v31 = vmax.f32 %v342_v18, 0.0  ;;  %v1598_v11 = vld [vmem:[%s2755_s7 + $0x38] sm:$0xff]  ;;  %v506_v13 = vrot.slane %v498_v12, %v2073_v44  ;;  %v502_v16 = vrot.slane %v498_v12, %v2076_v46 }
 0x254   :  { %v348_v28 = vadd.f32 %v347_v25, %v278_v21  ;;  %v355_v33 = vmax.f32 %v344_v22, 0.0 }
 0x255   :  { %v356_v32 = vmax.f32 %v346_v24, 0.0  ;;  %vm2257_vm1 = vcmp.eq.s32.totalorder %v506_v13, 1  ;;  %vm2261_vm2 = vcmp.eq.s32.totalorder %v502_v16, 1 }
 0x256   :  { %v357_v34 = vmax.f32 %v348_v28, 0.0  ;;  %vm1565_vm3 = vmpackc.low %vm2257_vm1, %vm2257_vm1 }
 0x257   :  { %v364_v35 = vpack.c.bf16 %v356_v32, %v354_v31  ;;  %vm1568_vm4 = vmpackc.low %vm2261_vm2, %vm2261_vm2 }
 0x258   :  { %v365_v36 = vpack.c.bf16 %v357_v34, %v355_v33 }
 0x25a   :  { %409 = vmatprep.subr.bf16.mxu0 %v365_v36 }
 0x25b   :  { %410 = vmatpush1.bf16.msra.mxu0 %v364_v35 }
 0x25e   :  { %1553 = vmatmul.mubr.msk.bf16.vlgmr.msra.gmra.mrb[8].mxu0 %vm400_vm14, %v1882_v37 }
 0x25f   :  { %449 = vmatprep.mubr.bf16.mxu0 %v1922_v2 }
 0x266   :  { %1554 = vmatmul.mubr.msk.bf16.gmra.mrb[12].mxu0 %vm400_vm14, %v1883_v38 }
 0x267   :  { %648 = vmatprep.mubr.bf16.mxu0 %v1922_v2 }
 0x331   :  { %v441_v40 = vpop.f32.mrb[8].mxu0 }
 0x332   :  { %v442_v41 = vadd.f32 %v441_v40, %v373_v39  ;;  %v443_v43 = vpop.f32.mrb[9].mxu0 }
 0x333   :  { %v444_v48 = vadd.f32 %v443_v43, %v373_v39  ;;  %v445_v49 = vpop.f32.mrb[10].mxu0 }
 0x334   :  { %v446_v50 = vadd.f32 %v445_v49, %v378_v45  ;;  %v447_v51 = vpop.f32.mrb[11].mxu0  ;;  %v2197_v53 = vadd.f32 %v442_v41, %v2019_v14 }
 0x335   :  { %v448_v52 = vadd.f32 %v447_v51, %v378_v45  ;;  %v2203_v55 = vadd.f32 %v444_v48, %v2023_v17  ;;  %v547_v45 = vsel %vm521_vm5, 1, %v1922_v2 }
 0x336   :  { %v2200_v54 = vadd.f32 %v446_v50, %v2021_v15  ;;  %v388_v15 = vpop.permute.xlu1 %387 }
 0x337   :  { %v2206_v56 = vadd.f32 %v448_v52, %v2025_v19 }
 0x338   :  { %v1755_v57 = vpack.i.bf16 %v2200_v54, %v2197_v53 }
 0x339   :  { %v451_v59 = vpop.f32.mrb[12].mxu0  ;;  %v1760_v60 = vpack.i.bf16 %v2206_v56, %v2203_v55 }
 0x33a   :  { %v452_v61 = vadd.f32 %v451_v59, %v383_v58  ;;  %v453_v14 = vpop.f32.mrb[13].mxu0  ;;  %1756 = vrot.lane.b32.xlu0 %v1755_v57, %s1925_s11 }
 0x33b   :  { %v454_v62 = vadd.f32 %v453_v14, %v383_v58  ;;  %v455_v63 = vpop.f32.mrb[14].mxu0  ;;  %1761 = vrot.lane.b32.xlu1 %v1760_v60, %s1925_s11 }
 0x33c   :  { %v456_v17 = vadd.f32 %v455_v63, %v388_v15  ;;  %v457_v0 = vpop.f32.mrb[15].mxu0  ;;  %v2213_v1 = vadd.f32 %v452_v61, %v2031_v26  ;;  %v1559_v26 = vld [vmem:[%s2753_s5 + $0x20] sm:$0xff]  ;;  %v555_v61 = vrot.slane %v547_v45, %v2073_v44 }
 0x33d   :  { %v458_v19 = vadd.f32 %v457_v0, %v388_v15  ;;  %v2219_v4 = vadd.f32 %v454_v62, %v2035_v29  ;;  %v1561_v29 = vld [vmem:[%s2753_s5 + $0x30] sm:$0xff] }
 0x33e   :  { %v2216_v3 = vadd.f32 %v456_v17, %v2033_v27  ;;  %v1560_v27 = vld [vmem:[%s2753_s5 + $0x28] sm:$0xff]  ;;  %vm2322_vm7 = vcmp.eq.s32.totalorder %v555_v61, 1 }
 0x33f   :  { %v2222_v5 = vadd.f32 %v458_v19, %v2037_v30  ;;  %v1562_v30 = vld [vmem:[%s2753_s5 + $0x38] sm:$0xff]  ;;  %v468_v19 = vpack.c.bf16 %v2200_v54, %v2197_v53  ;;  %vm1577_vm8 = vmpackc.low %vm2322_vm7, %vm2322_vm7 }
 0x340   :  { %v1765_v6 = vpack.i.bf16 %v2216_v3, %v2213_v1 }
 0x341   :  { %v1770_v7 = vpack.i.bf16 %v2222_v5, %v2219_v4 }
 0x342   :  { %1766 = vrot.lane.b32.xlu0 %v1765_v6, %s1925_s11 }
 0x343   :  { %1771 = vrot.lane.b32.xlu1 %v1770_v7, %s1925_s11 }
 0x346   :  { %1776 = vrot.lane.b32.xlu0 %v1755_v57, %s1926_s12 }
 0x347   :  { %1781 = vrot.lane.b32.xlu1 %v1760_v60, %s1926_s12  ;;  %v469_v60 = vpack.c.bf16 %v2206_v56, %v2203_v55 }
 0x34a   :  { %1786 = vrot.lane.b32.xlu0 %v1765_v6, %s1926_s12  ;;  %v551_v6 = vrot.slane %v547_v45, %v2076_v46 }
 0x34b   :  { %1791 = vrot.lane.b32.xlu1 %v1770_v7, %s1926_s12 }
 0x34c   :  { %vm2331_vm9 = vcmp.eq.s32.totalorder %v551_v6, 1 }
 0x34d   :  { %vm1580_vm10 = vmpackc.low %vm2331_vm9, %vm2331_vm9 }
 0x34e   :  { %582 = vperm.xlu0 %1713, %v1559_v26  }
 0x34f   :  { %587 = vperm.xlu1 %1714, %v1560_v27   ;;  %v471_v27 = vpack.c.bf16 %v2222_v5, %v2219_v4 }
 0x352   :  { %592 = vperm.xlu0 %1713, %v1561_v29   ;;  %v1886_v29 = vld [vmem:[%s2754_s6 + $0x10] sm:$0xff]  }
 0x353   :  { %597 = vperm.xlu1 %1714, %v1562_v30  }
 0x356   :  { %693 = vperm.xlu0 %1713, %v1595_v8  }
 0x357   :  { %698 = vperm.xlu1 %1714, %v1596_v9  }
 0x35a   :  { %703 = vperm.xlu0 %1713, %v1597_v10  }
 0x35b   :  { %708 = vperm.xlu1 %1714, %v1598_v11   ;;  %v470_v11 = vpack.c.bf16 %v2216_v3, %v2213_v1 }
 0x3ac   :  { %v1757_v18 = vpop.permute.xlu0 %1756 }
 0x3ad   :  { %v1759_v20 = vunpack.i.h.bf16 %v1757_v18  ;;  %v1758_v21 = vunpack.i.l.bf16 %v1757_v18  ;;  %v1762_v22 = vpop.permute.xlu1 %1761 }
 0x3ae   :  { %v1764_v24 = vunpack.i.h.bf16 %v1762_v22  ;;  %v1763_v25 = vunpack.i.l.bf16 %v1762_v22 }
 0x3b0   :  { %v490_v31 = vsel %vm489_vm0, %v1758_v21, %v1763_v25  ;;  %v491_v32 = vsel %vm489_vm0, %v1759_v20, %v1764_v24  ;;  %v494_v33 = vsel %vm489_vm0, %v1763_v25, %v1758_v21  ;;  %v495_v34 = vsel %vm489_vm0, %v1764_v24, %v1759_v20 }
 0x3b1   :  { %v1566_v35 = vpack.c.bf16 %v491_v32, %v490_v31  ;;  %v1569_v36 = vpack.c.bf16 %v495_v34, %v494_v33  ;;  %v1884_v31 = vld [vmem:[%s2752_s4 + $0x10] sm:$0xff]   ;;  %v1885_v32 = vld [vmem:[%s2752_s4 + $0x18] sm:$0xff]  }
 0x3b3   :  { %1567 = vmatprep.subr.msk.bf16.mxu0 %vm1565_vm3, %v1566_v35 }
 0x3b4   :  { %v1767_v37 = vpop.permute.xlu0 %1766  ;;  %1570 = vmatpush1.bf16.msk.msra.mxu0 %vm1568_vm4, %v1569_v36 }
 0x3b5   :  { %v1769_v38 = vunpack.i.h.bf16 %v1767_v37  ;;  %v1768_v39 = vunpack.i.l.bf16 %v1767_v37  ;;  %v1772_v40 = vpop.permute.xlu1 %1771 }
 0x3b6   :  { %v1774_v41 = vunpack.i.h.bf16 %v1772_v40  ;;  %v1773_v43 = vunpack.i.l.bf16 %v1772_v40 }
 0x3b8   :  { %v492_v48 = vsel %vm489_vm0, %v1768_v39, %v1773_v43  ;;  %v493_v49 = vsel %vm489_vm0, %v1769_v38, %v1774_v41  ;;  %v496_v50 = vsel %vm489_vm0, %v1773_v43, %v1768_v39  ;;  %v497_v51 = vsel %vm489_vm0, %v1774_v41, %v1769_v38  ;;  %v1777_v52 = vpop.permute.xlu0 %1776 }
 0x3b9   :  { %v1572_v57 = vpack.c.bf16 %v493_v49, %v492_v48  ;;  %v1575_v58 = vpack.c.bf16 %v497_v51, %v496_v50  ;;  %v1782_v59 = vpop.permute.xlu1 %1781  ;;  %v1779_v14 = vunpack.i.h.bf16 %v1777_v52  ;;  %v1778_v15 = vunpack.i.l.bf16 %v1777_v52 }
 0x3ba   :  { %v1784_v62 = vunpack.i.h.bf16 %v1782_v59  ;;  %v1783_v63 = vunpack.i.l.bf16 %v1782_v59 }
 0x3bb   :  { %1573 = vmatprep.subr.msk.bf16.mxu0 %vm1565_vm3, %v1572_v57  ;;  %vm841_vm3 = vcmp.lt.s32.totalorder %v2070_v42, 124 }
 0x3bc   :  { %1576 = vmatpush1.bf16.msk.msra.mxu0 %vm1568_vm4, %v1575_v58  ;;  %v1787_v17 = vpop.permute.xlu0 %1786  ;;  %v543_v7 = vsel %vm538_vm6, %v1783_v63, %v1778_v15  ;;  %v544_v26 = vsel %vm538_vm6, %v1784_v62, %v1779_v14  ;;  %v539_v13 = vsel %vm538_vm6, %v1778_v15, %v1783_v63  ;;  %v540_v16 = vsel %vm538_vm6, %v1779_v14, %v1784_v62 }
 0x3bd   :  { %v1792_v0 = vpop.permute.xlu1 %1791  ;;  %620 = vmatprep.subr.bf16.mxu0 %v469_v60  ;;  %v1789_v30 = vunpack.i.h.bf16 %v1787_v17  ;;  %v1788_v8 = vunpack.i.l.bf16 %v1787_v17  ;;  %v1578_v18 = vpack.c.bf16 %v544_v26, %v543_v7  ;;  %v1581_v22 = vpack.c.bf16 %v540_v16, %v539_v13 }
 0x3be   :  { %v1794_v9 = vunpack.i.h.bf16 %v1792_v0  ;;  %v1793_v10 = vunpack.i.l.bf16 %v1792_v0  ;;  %vm858_vm4 = vcmp.lt.s32.totalorder %v2078_v47, 124 }
 0x3c0   :  { %621 = vmatpush1.bf16.msra.mxu0 %v468_v19  ;;  %v545_v20 = vsel %vm538_vm6, %v1793_v10, %v1788_v8  ;;  %v546_v21 = vsel %vm538_vm6, %v1794_v9, %v1789_v30  ;;  %v541_v23 = vsel %vm538_vm6, %v1788_v8, %v1793_v10  ;;  %v542_v24 = vsel %vm538_vm6, %v1789_v30, %v1794_v9  ;;  %v1887_v30 = vld [vmem:[%s2754_s6 + $0x18] sm:$0xff]  }
 0x3c1   :  { %622 = vmatprep.subr.bf16.mxu0 %v471_v27  ;;  %v1584_v25 = vpack.c.bf16 %v546_v21, %v545_v20  ;;  %v1587_v28 = vpack.c.bf16 %v542_v24, %v541_v23 }
 0x3c4   :  { %623 = vmatpush1.bf16.msra.mxu0 %v470_v11 }
 0x3c5   :  { %1579 = vmatprep.subr.msk.bf16.mxu0 %vm1577_vm8, %v1578_v18 }
 0x3c8   :  { %1582 = vmatpush1.bf16.msk.msra.mxu0 %vm1580_vm10, %v1581_v22 }
 0x3c9   :  { %1585 = vmatprep.subr.msk.bf16.mxu0 %vm1577_vm8, %v1584_v25 }
 0x3cc   :  { %1588 = vmatpush1.bf16.msk.msra.mxu0 %vm1580_vm10, %v1587_v28  ;;  %vm1129_vm10 = vcmp.lt.s32.totalorder %v2078_v47, 8 }
 0x3cd   :  { %v583_v33 = vpop.permute.xlu0 %582 }
 0x3ce   :  { %v588_v37 = vpop.permute.xlu1 %587 }
 0x3cf   :  { %1589 = vmatmul.mubr.msk.bf16.vlgmr.msra.gmra.mrb[16].mxu0 %vm290_vm13, %v1884_v31 }
 0x3d0   :  { %658 = vmatprep.mubr.bf16.mxu0 %v1922_v2 }
 0x3d1   :  { %v593_v52 = vpop.permute.xlu0 %592 }
 0x3d2   :  { %v598_v61 = vpop.permute.xlu1 %597 }
 0x3d5   :  { %v694_v8 = vpop.permute.xlu0 %693 }
 0x3d6   :  { %v699_v12 = vpop.permute.xlu1 %698 }
 0x3d7   :  { %1590 = vmatmul.mubr.msk.bf16.gmra.mrb[20].mxu0 %vm290_vm13, %v1885_v32 }
 0x3d8   :  { %1079 = vmatprep.mubr.bf16.mxu0 %v1922_v2 }
 0x3d9   :  { %v704_v31 = vpop.permute.xlu0 %703 }
 0x4a2   :  { %v650_v34 = vpop.f32.mrb[16].mxu0 }
 0x4a3   :  { %v651_v35 = vadd.f32 %v650_v34, %v583_v33  ;;  %v652_v36 = vpop.f32.mrb[17].mxu0 }
 0x4a4   :  { %v653_v38 = vadd.f32 %v652_v36, %v583_v33  ;;  %v654_v39 = vpop.f32.mrb[18].mxu0 }
 0x4a5   :  { %v655_v40 = vadd.f32 %v654_v39, %v588_v37  ;;  %v656_v41 = vpop.f32.mrb[19].mxu0  ;;  %v669_v45 = vmax.f32 %v651_v35, 0.0 }
 0x4a6   :  { %v657_v43 = vadd.f32 %v656_v41, %v588_v37  ;;  %v670_v49 = vmax.f32 %v653_v38, 0.0 }
 0x4a7   :  { %v671_v48 = vmax.f32 %v655_v40, 0.0 }
 0x4a8   :  { %v672_v50 = vmax.f32 %v657_v43, 0.0 }
 0x4a9   :  { %v682_v51 = vpack.c.bf16 %v671_v48, %v669_v45  ;;  %v1643_v48 = vld [vmem:[%s2755_s7 + $0x40] sm:$0xff] }
 0x4aa   :  { %v683_v57 = vpack.c.bf16 %v672_v50, %v670_v49  ;;  %v660_v58 = vpop.f32.mrb[20].mxu0  ;;  %v1644_v49 = vld [vmem:[%s2755_s7 + $0x48] sm:$0xff]  ;;  %v1645_v50 = vld [vmem:[%s2755_s7 + $0x50] sm:$0xff] }
 0x4ab   :  { %v661_v59 = vadd.f32 %v660_v58, %v593_v52  ;;  %v662_v60 = vpop.f32.mrb[21].mxu0 }
 0x4ac   :  { %v663_v14 = vadd.f32 %v662_v60, %v593_v52  ;;  %v664_v15 = vpop.f32.mrb[22].mxu0  ;;  %727 = vmatprep.subr.bf16.mxu1 %v683_v57  ;;  %v818_v52 = vsel %vm792_vm11, 1, %v1922_v2 }
 0x4ad   :  { %v665_v62 = vadd.f32 %v664_v15, %v598_v61  ;;  %v666_v63 = vpop.f32.mrb[23].mxu0  ;;  %728 = vmatpush1.bf16.msra.mxu1 %v682_v51  ;;  %v673_v0 = vmax.f32 %v661_v59, 0.0  ;;  %v1646_v51 = vld [vmem:[%s2755_s7 + $0x58] sm:$0xff]  ;;  %v826_v57 = vrot.slane %v818_v52, %v2073_v44  ;;  %v822_v58 = vrot.slane %v818_v52, %v2076_v46 }
 0x4ae   :  { %v667_v17 = vadd.f32 %v666_v63, %v598_v61  ;;  %v674_v6 = vmax.f32 %v663_v14, 0.0 }
 0x4af   :  { %v675_v19 = vmax.f32 %v665_v62, 0.0  ;;  %vm2431_vm15 = vcmp.eq.s32.totalorder %v826_v57, 1  ;;  %vm2435_vm0 = vcmp.eq.s32.totalorder %v822_v58, 1 }
 0x4b0   :  { %v676_v7 = vmax.f32 %v667_v17, 0.0  ;;  %vm1613_vm1 = vmpackc.low %vm2431_vm15, %vm2431_vm15  ;;  %v1888_v17 = vld [vmem:[%s2752_s4 + $0x20] sm:$0xff]  }
 0x4b1   :  { %v684_v26 = vpack.c.bf16 %v675_v19, %v673_v0  ;;  %vm1616_vm2 = vmpackc.low %vm2435_vm0, %vm2435_vm0 }
 0x4b2   :  { %v685_v27 = vpack.c.bf16 %v676_v7, %v674_v6 }
 0x4b4   :  { %729 = vmatprep.subr.bf16.mxu1 %v685_v27 }
 0x4b5   :  { %730 = vmatpush1.bf16.msra.mxu1 %v684_v26 }
 0x4b8   :  { %1601 = vmatmul.mubr.msk.bf16.vlgmr.msra.gmra.mrb[8].mxu1 %vm400_vm14, %v1886_v29 }
 0x4b9   :  { %769 = vmatprep.mubr.bf16.mxu1 %v1922_v2 }
 0x4c0   :  { %1602 = vmatmul.mubr.msk.bf16.gmra.mrb[12].mxu1 %vm400_vm14, %v1887_v30 }
 0x4c1   :  { %968 = vmatprep.mubr.bf16.mxu1 %v1922_v2 }
 0x58b   :  { %v761_v9 = vpop.f32.mrb[8].mxu1 }
 0x58c   :  { %v762_v10 = vadd.f32 %v761_v9, %v694_v8  ;;  %v763_v11 = vpop.f32.mrb[9].mxu1 }
 0x58d   :  { %v764_v13 = vadd.f32 %v763_v11, %v694_v8  ;;  %v765_v16 = vpop.f32.mrb[10].mxu1 }
 0x58e   :  { %v766_v18 = vadd.f32 %v765_v16, %v699_v12  ;;  %v767_v20 = vpop.f32.mrb[11].mxu1  ;;  %v2371_v22 = vadd.f32 %v762_v10, %v2197_v53 }
 0x58f   :  { %v768_v21 = vadd.f32 %v767_v20, %v699_v12  ;;  %v2377_v24 = vadd.f32 %v764_v13, %v2203_v55  ;;  %v867_v12 = vsel %vm841_vm3, 1, %v1922_v2 }
 0x590   :  { %v2374_v23 = vadd.f32 %v766_v18, %v2200_v54  ;;  %v709_v54 = vpop.permute.xlu1 %708 }
 0x591   :  { %v2380_v25 = vadd.f32 %v768_v21, %v2206_v56 }
 0x592   :  { %v1795_v28 = vpack.i.bf16 %v2374_v23, %v2371_v22 }
 0x593   :  { %v771_v32 = vpop.f32.mrb[12].mxu1  ;;  %v1800_v33 = vpack.i.bf16 %v2380_v25, %v2377_v24 }
 0x594   :  { %v772_v34 = vadd.f32 %v771_v32, %v704_v31  ;;  %v773_v53 = vpop.f32.mrb[13].mxu1  ;;  %1796 = vrot.lane.b32.xlu0 %v1795_v28, %s1927_s14  ;;  %v789_v32 = vpack.c.bf16 %v2380_v25, %v2377_v24 }
 0x595   :  { %v774_v35 = vadd.f32 %v773_v53, %v704_v31  ;;  %v775_v36 = vpop.f32.mrb[14].mxu1  ;;  %1801 = vrot.lane.b32.xlu1 %v1800_v33, %s1927_s14 }
 0x596   :  { %v776_v55 = vadd.f32 %v775_v36, %v709_v54  ;;  %v777_v37 = vpop.f32.mrb[15].mxu1  ;;  %v2387_v38 = vadd.f32 %v772_v34, %v2213_v1  ;;  %v1607_v1 = vld [vmem:[%s2753_s5 + $0x40] sm:$0xff] }
 0x597   :  { %v778_v56 = vadd.f32 %v777_v37, %v709_v54  ;;  %v2393_v40 = vadd.f32 %v774_v35, %v2219_v4  ;;  %v1609_v4 = vld [vmem:[%s2753_s5 + $0x50] sm:$0xff]  ;;  %v788_v37 = vpack.c.bf16 %v2374_v23, %v2371_v22 }
 0x598   :  { %v2390_v39 = vadd.f32 %v776_v55, %v2216_v3  ;;  %v1608_v3 = vld [vmem:[%s2753_s5 + $0x48] sm:$0xff] }
 0x599   :  { %v2396_v41 = vadd.f32 %v778_v56, %v2222_v5  ;;  %v1610_v5 = vld [vmem:[%s2753_s5 + $0x58] sm:$0xff]  ;;  %v871_v56 = vrot.slane %v867_v12, %v2076_v46 }
 0x59a   :  { %v1805_v43 = vpack.i.bf16 %v2390_v39, %v2387_v38 }
 0x59b   :  { %v1810_v45 = vpack.i.bf16 %v2396_v41, %v2393_v40  ;;  %vm2505_vm7 = vcmp.eq.s32.totalorder %v871_v56, 1 }
 0x59c   :  { %1806 = vrot.lane.b32.xlu0 %v1805_v43, %s1927_s14  ;;  %vm1628_vm8 = vmpackc.low %vm2505_vm7, %vm2505_vm7 }
 0x59d   :  { %1811 = vrot.lane.b32.xlu1 %v1810_v45, %s1927_s14 }
 0x5a0   :  { %1816 = vrot.lane.b32.xlu0 %v1795_v28, %s1928_s15 }
 0x5a1   :  { %1821 = vrot.lane.b32.xlu1 %v1800_v33, %s1928_s15  ;;  %v875_v33 = vrot.slane %v867_v12, %v2073_v44 }
 0x5a3   :  { %vm2496_vm5 = vcmp.eq.s32.totalorder %v875_v33, 1 }
 0x5a4   :  { %1826 = vrot.lane.b32.xlu0 %v1805_v43, %s1928_s15  ;;  %vm1625_vm6 = vmpackc.low %vm2496_vm5, %vm2496_vm5 }
 0x5a5   :  { %1831 = vrot.lane.b32.xlu1 %v1810_v45, %s1928_s15 }
 0x5a8   :  { %902 = vperm.xlu0 %1713, %v1607_v1   ;;  %v791_v1 = vpack.c.bf16 %v2396_v41, %v2393_v40 }
 0x5a9   :  { %907 = vperm.xlu1 %1714, %v1608_v3   ;;  %v1891_v3 = vld [vmem:[%s2754_s6 + $0x28] sm:$0xff]  }
 0x5ac   :  { %912 = vperm.xlu0 %1713, %v1609_v4  }
 0x5ad   :  { %917 = vperm.xlu1 %1714, %v1610_v5  }
 0x5b0   :  { %1013 = vperm.xlu0 %1713, %v1643_v48  }
 0x5b1   :  { %1018 = vperm.xlu1 %1714, %v1644_v49  }
 0x5b4   :  { %1023 = vperm.xlu0 %1713, %v1645_v50   ;;  %v790_v50 = vpack.c.bf16 %v2390_v39, %v2387_v38 }
 0x5b5   :  { %1028 = vperm.xlu1 %1714, %v1646_v51  }
 0x606   :  { %v1797_v59 = vpop.permute.xlu0 %1796 }
 0x607   :  { %v1799_v60 = vunpack.i.h.bf16 %v1797_v59  ;;  %v1798_v61 = vunpack.i.l.bf16 %v1797_v59  ;;  %v1802_v14 = vpop.permute.xlu1 %1801 }
 0x608   :  { %v1804_v62 = vunpack.i.h.bf16 %v1802_v14  ;;  %v1803_v63 = vunpack.i.l.bf16 %v1802_v14 }
 0x60a   :  { %v810_v0 = vsel %vm809_vm12, %v1798_v61, %v1803_v63  ;;  %v811_v19 = vsel %vm809_vm12, %v1799_v60, %v1804_v62  ;;  %v814_v6 = vsel %vm809_vm12, %v1803_v63, %v1798_v61  ;;  %v815_v7 = vsel %vm809_vm12, %v1804_v62, %v1799_v60 }
 0x60b   :  { %v1614_v26 = vpack.c.bf16 %v811_v19, %v810_v0  ;;  %v1617_v27 = vpack.c.bf16 %v815_v7, %v814_v6  ;;  %v1889_v0 = vld [vmem:[%s2752_s4 + $0x28] sm:$0xff]  }
 0x60d   :  { %1615 = vmatprep.subr.msk.bf16.mxu1 %vm1613_vm1, %v1614_v26 }
 0x60e   :  { %v1807_v29 = vpop.permute.xlu0 %1806  ;;  %1618 = vmatpush1.bf16.msk.msra.mxu1 %vm1616_vm2, %v1617_v27 }
 0x60f   :  { %v1809_v30 = vunpack.i.h.bf16 %v1807_v29  ;;  %v1808_v8 = vunpack.i.l.bf16 %v1807_v29  ;;  %v1812_v9 = vpop.permute.xlu1 %1811 }
 0x610   :  { %v1814_v10 = vunpack.i.h.bf16 %v1812_v9  ;;  %v1813_v11 = vunpack.i.l.bf16 %v1812_v9 }
 0x612   :  { %v812_v13 = vsel %vm809_vm12, %v1808_v8, %v1813_v11  ;;  %v813_v16 = vsel %vm809_vm12, %v1809_v30, %v1814_v10  ;;  %v816_v18 = vsel %vm809_vm12, %v1813_v11, %v1808_v8  ;;  %v817_v20 = vsel %vm809_vm12, %v1814_v10, %v1809_v30  ;;  %v1817_v42 = vpop.permute.xlu0 %1816 }
 0x613   :  { %v1620_v21 = vpack.c.bf16 %v813_v16, %v812_v13  ;;  %v1623_v28 = vpack.c.bf16 %v817_v20, %v816_v18  ;;  %v1822_v31 = vpop.permute.xlu1 %1821  ;;  %v1819_v34 = vunpack.i.h.bf16 %v1817_v42  ;;  %v1818_v53 = vunpack.i.l.bf16 %v1817_v42 }
 0x614   :  { %v1824_v54 = vunpack.i.h.bf16 %v1822_v31  ;;  %v1823_v35 = vunpack.i.l.bf16 %v1822_v31 }
 0x615   :  { %1621 = vmatprep.subr.msk.bf16.mxu1 %vm1613_vm1, %v1620_v21 }
 0x616   :  { %1624 = vmatpush1.bf16.msk.msra.mxu1 %vm1616_vm2, %v1623_v28  ;;  %v1827_v36 = vpop.permute.xlu0 %1826  ;;  %v863_v43 = vsel %vm858_vm4, %v1823_v35, %v1818_v53  ;;  %v864_v45 = vsel %vm858_vm4, %v1824_v54, %v1819_v34  ;;  %v859_v52 = vsel %vm858_vm4, %v1818_v53, %v1823_v35  ;;  %v860_v57 = vsel %vm858_vm4, %v1819_v34, %v1824_v54 }
 0x617   :  { %v1832_v55 = vpop.permute.xlu1 %1831  ;;  %940 = vmatprep.subr.bf16.mxu1 %v789_v32  ;;  %v1829_v4 = vunpack.i.h.bf16 %v1827_v36  ;;  %v1828_v5 = vunpack.i.l.bf16 %v1827_v36  ;;  %v1626_v58 = vpack.c.bf16 %v864_v45, %v863_v43  ;;  %v1629_v61 = vpack.c.bf16 %v860_v57, %v859_v52 }
 0x618   :  { %v1834_v48 = vunpack.i.h.bf16 %v1832_v55  ;;  %v1833_v49 = vunpack.i.l.bf16 %v1832_v55  ;;  %vm1178_vm2 = vcmp.lt.s32.totalorder %v2078_v47, 120 }
 0x61a   :  { %941 = vmatpush1.bf16.msra.mxu1 %v788_v37  ;;  %v865_v59 = vsel %vm858_vm4, %v1833_v49, %v1828_v5  ;;  %v866_v60 = vsel %vm858_vm4, %v1834_v48, %v1829_v4  ;;  %v861_v14 = vsel %vm858_vm4, %v1828_v5, %v1833_v49  ;;  %v862_v15 = vsel %vm858_vm4, %v1829_v4, %v1834_v48 }
 0x61b   :  { %942 = vmatprep.subr.bf16.mxu1 %v791_v1  ;;  %v1632_v62 = vpack.c.bf16 %v866_v60, %v865_v59  ;;  %v1635_v63 = vpack.c.bf16 %v862_v15, %v861_v14  ;;  %v1890_v1 = vld [vmem:[%s2754_s6 + $0x20] sm:$0xff]  }
 0x61e   :  { %943 = vmatpush1.bf16.msra.mxu1 %v790_v50 }
 0x61f   :  { %1627 = vmatprep.subr.msk.bf16.mxu1 %vm1625_vm6, %v1626_v58 }
 0x622   :  { %1630 = vmatpush1.bf16.msk.msra.mxu1 %vm1628_vm8, %v1629_v61 }
 0x623   :  { %1633 = vmatprep.subr.msk.bf16.mxu1 %vm1625_vm6, %v1632_v62 }
 0x626   :  { %1636 = vmatpush1.bf16.msk.msra.mxu1 %vm1628_vm8, %v1635_v63 }
 0x627   :  { %v903_v19 = vpop.permute.xlu0 %902 }
 0x628   :  { %v908_v27 = vpop.permute.xlu1 %907 }
 0x629   :  { %1637 = vmatmul.mubr.msk.bf16.vlgmr.msra.gmra.mrb[16].mxu1 %vm290_vm13, %v1888_v17 }
 0x62a   :  { %978 = vmatprep.mubr.bf16.mxu1 %v1922_v2 }
 0x62b   :  { %v913_v20 = vpop.permute.xlu0 %912 }
 0x62c   :  { %v918_v32 = vpop.permute.xlu1 %917 }
 0x62f   :  { %v1014_v4 = vpop.permute.xlu0 %1013 }
 0x630   :  { %v1019_v50 = vpop.permute.xlu1 %1018 }
 0x631   :  { %1638 = vmatmul.mubr.msk.bf16.gmra.mrb[20].mxu1 %vm290_vm13, %v1889_v0 }
 0x632   :  { %1399 = vmatprep.mubr.bf16.mxu1 %v1922_v2 }
 0x633   :  { %v1024_v63 = vpop.permute.xlu0 %1023 }
 0x6fc   :  { %v970_v6 = vpop.f32.mrb[16].mxu1 }
 0x6fd   :  { %v971_v7 = vadd.f32 %v970_v6, %v903_v19  ;;  %v972_v26 = vpop.f32.mrb[17].mxu1 }
 0x6fe   :  { %v973_v29 = vadd.f32 %v972_v26, %v903_v19  ;;  %v974_v30 = vpop.f32.mrb[18].mxu1 }
 0x6ff   :  { %v975_v8 = vadd.f32 %v974_v30, %v908_v27  ;;  %v976_v9 = vpop.f32.mrb[19].mxu1  ;;  %v989_v11 = vmax.f32 %v971_v7, 0.0 }
 0x700   :  { %v977_v10 = vadd.f32 %v976_v9, %v908_v27  ;;  %v990_v13 = vmax.f32 %v973_v29, 0.0 }
 0x701   :  { %v991_v12 = vmax.f32 %v975_v8, 0.0 }
 0x702   :  { %v992_v16 = vmax.f32 %v977_v10, 0.0 }
 0x703   :  { %v1002_v18 = vpack.c.bf16 %v991_v12, %v989_v11  ;;  %v1691_v11 = vld [vmem:[%s2755_s7 + $0x60] sm:$0xff]  ;;  %v1692_v12 = vld [vmem:[%s2755_s7 + $0x68] sm:$0xff] }
 0x704   :  { %v1003_v42 = vpack.c.bf16 %v992_v16, %v990_v13  ;;  %v980_v21 = vpop.f32.mrb[20].mxu1  ;;  %v1693_v13 = vld [vmem:[%s2755_s7 + $0x70] sm:$0xff]  ;;  %v1694_v16 = vld [vmem:[%s2755_s7 + $0x78] sm:$0xff] }
 0x705   :  { %v981_v28 = vadd.f32 %v980_v21, %v913_v20  ;;  %v982_v31 = vpop.f32.mrb[21].mxu1 }
 0x706   :  { %v983_v33 = vadd.f32 %v982_v31, %v913_v20  ;;  %v984_v34 = vpop.f32.mrb[22].mxu1  ;;  %1047 = vmatprep.subr.bf16.mxu0 %v1003_v42  ;;  %v1435_v20 = vld [vmem:[%s2757_s9 + $0x8] sm:$0xff]  ;;  %v1897_v42 = vld [vmem:[%s2748_s0] sm:$0x3] }
 0x707   :  { %v985_v53 = vadd.f32 %v984_v34, %v918_v32  ;;  %v986_v54 = vpop.f32.mrb[23].mxu1  ;;  %1048 = vmatpush1.bf16.msra.mxu0 %v1002_v18  ;;  %v993_v36 = vmax.f32 %v981_v28, 0.0  ;;  %v1434_v18 = vld [vmem:[%s2757_s9] sm:$0xff]  ;;  %vm1112_vm9 = vcmp.ge.s32.totalorder %v1897_v42, 8  ;;  %vm1161_vm1 = vcmp.lt.s32.totalorder %v1897_v42, 120 }
 0x708   :  { %v987_v35 = vadd.f32 %v986_v54, %v918_v32  ;;  %v994_v37 = vmax.f32 %v983_v33, 0.0  ;;  %v1138_v21 = vsel %vm1112_vm9, 1, %v1922_v2 }
 0x709   :  { %v995_v55 = vmax.f32 %v985_v53, 0.0  ;;  %v1146_v28 = vrot.slane %v1138_v21, %v2073_v44  ;;  %v1142_v31 = vrot.slane %v1138_v21, %v2076_v46 }
 0x70a   :  { %v996_v56 = vmax.f32 %v987_v35, 0.0 }
 0x70b   :  { %v1004_v43 = vpack.c.bf16 %v995_v55, %v993_v36  ;;  %vm2613_vm11 = vcmp.eq.s32.totalorder %v1146_v28, 1  ;;  %vm2617_vm12 = vcmp.eq.s32.totalorder %v1142_v31, 1 }
 0x70c   :  { %v1005_v45 = vpack.c.bf16 %v996_v56, %v994_v37  ;;  %vm1661_vm15 = vmpackc.low %vm2613_vm11, %vm2613_vm11 }
 0x70d   :  { %vm1664_vm0 = vmpackc.low %vm2617_vm12, %vm2617_vm12 }
 0x70e   :  { %1049 = vmatprep.subr.bf16.mxu0 %v1005_v45 }
 0x70f   :  { %1050 = vmatpush1.bf16.msra.mxu0 %v1004_v43 }
 0x712   :  { %1649 = vmatmul.mubr.msk.bf16.vlgmr.msra.gmra.mrb[24].mxu0 %vm400_vm14, %v1890_v1 }
 0x713   :  { %1089 = vmatprep.mubr.bf16.mxu0 %v1922_v2 }
 0x71a   :  { %1650 = vmatmul.mubr.msk.bf16.gmra.mrb[28].mxu0 %vm400_vm14, %v1891_v3 }
 0x71b   :  { %1288 = vmatprep.mubr.bf16.mxu0 %v1922_v2 }
 0x7e5   :  { %v1081_v5 = vpop.f32.mrb[24].mxu0 }
 0x7e6   :  { %v1082_v48 = vadd.f32 %v1081_v5, %v1014_v4  ;;  %v1083_v49 = vpop.f32.mrb[25].mxu0 }
 0x7e7   :  { %v1084_v51 = vadd.f32 %v1083_v49, %v1014_v4  ;;  %v1085_v52 = vpop.f32.mrb[26].mxu0 }
 0x7e8   :  { %v1086_v57 = vadd.f32 %v1085_v52, %v1019_v50  ;;  %v1087_v58 = vpop.f32.mrb[27].mxu0  ;;  %v2545_v60 = vadd.f32 %v1082_v48, %v2371_v22  ;;  %v1187_v52 = vsel %vm1161_vm1, 1, %v1922_v2 }
 0x7e9   :  { %v1088_v59 = vadd.f32 %v1087_v58, %v1019_v50  ;;  %v2551_v14 = vadd.f32 %v1084_v51, %v2377_v24 }
 0x7ea   :  { %v2548_v61 = vadd.f32 %v1086_v57, %v2374_v23  ;;  %v1029_v23 = vpop.permute.xlu1 %1028 }
 0x7eb   :  { %v2554_v15 = vadd.f32 %v1088_v59, %v2380_v25 }
 0x7ec   :  { %v1835_v62 = vpack.i.bf16 %v2548_v61, %v2545_v60 }
 0x7ed   :  { %v1091_v17 = vpop.f32.mrb[28].mxu0  ;;  %v1840_v0 = vpack.i.bf16 %v2554_v15, %v2551_v14 }
 0x7ee   :  { %v1092_v19 = vadd.f32 %v1091_v17, %v1024_v63  ;;  %v1093_v22 = vpop.f32.mrb[29].mxu0  ;;  %1836 = vrot.lane.b32.xlu0 %v1835_v62, %s1929_s17 }
 0x7ef   :  { %v1094_v6 = vadd.f32 %v1093_v22, %v1024_v63  ;;  %v1095_v7 = vpop.f32.mrb[30].mxu0  ;;  %1841 = vrot.lane.b32.xlu1 %v1840_v0, %s1929_s17  ;;  %v1109_v22 = vpack.c.bf16 %v2554_v15, %v2551_v14 }
 0x7f0   :  { %v1096_v24 = vadd.f32 %v1095_v7, %v1029_v23  ;;  %v1097_v26 = vpop.f32.mrb[31].mxu0  ;;  %v2561_v27 = vadd.f32 %v1092_v19, %v2387_v38  ;;  %v1655_v38 = vld [vmem:[%s2753_s5 + $0x60] sm:$0xff] }
 0x7f1   :  { %v1098_v25 = vadd.f32 %v1097_v26, %v1029_v23  ;;  %v2567_v30 = vadd.f32 %v1094_v6, %v2393_v40  ;;  %v1657_v40 = vld [vmem:[%s2753_s5 + $0x70] sm:$0xff]  ;;  %v1195_v23 = vrot.slane %v1187_v52, %v2073_v44 }
 0x7f2   :  { %v2564_v29 = vadd.f32 %v1096_v24, %v2390_v39  ;;  %v1656_v39 = vld [vmem:[%s2753_s5 + $0x68] sm:$0xff] }
 0x7f3   :  { %v2570_v8 = vadd.f32 %v1098_v25, %v2396_v41  ;;  %v1658_v41 = vld [vmem:[%s2753_s5 + $0x78] sm:$0xff]  ;;  %vm2677_vm3 = vcmp.eq.s32.totalorder %v1195_v23, 1 }
 0x7f4   :  { %v1845_v9 = vpack.i.bf16 %v2564_v29, %v2561_v27  ;;  %vm1673_vm4 = vmpackc.low %vm2677_vm3, %vm2677_vm3 }
 0x7f5   :  { %v1850_v10 = vpack.i.bf16 %v2570_v8, %v2567_v30 }
 0x7f6   :  { %1846 = vrot.lane.b32.xlu0 %v1845_v9, %s1929_s17 }
 0x7f7   :  { %1851 = vrot.lane.b32.xlu1 %v1850_v10, %s1929_s17 }
 0x7fa   :  { %1856 = vrot.lane.b32.xlu0 %v1835_v62, %s1930_s18 }
 0x7fb   :  { %1861 = vrot.lane.b32.xlu1 %v1840_v0, %s1930_s18 }
 0x7fe   :  { %1866 = vrot.lane.b32.xlu0 %v1845_v9, %s1930_s18  ;;  %v1108_v9 = vpack.c.bf16 %v2548_v61, %v2545_v60 }
 0x7ff   :  { %1871 = vrot.lane.b32.xlu1 %v1850_v10, %s1930_s18  ;;  %v1191_v10 = vrot.slane %v1187_v52, %v2076_v46  ;;  %v1110_v46 = vpack.c.bf16 %v2564_v29, %v2561_v27 }
 0x801   :  { %vm2686_vm5 = vcmp.eq.s32.totalorder %v1191_v10, 1  ;;  %v1894_v10 = vld [vmem:[%s2754_s6 + $0x30] sm:$0xff]  }
 0x802   :  { %1222 = vperm.xlu0 %1713, %v1655_v38   ;;  %vm1676_vm6 = vmpackc.low %vm2686_vm5, %vm2686_vm5 }
 0x803   :  { %1227 = vperm.xlu1 %1714, %v1656_v39  }
 0x806   :  { %1232 = vperm.xlu0 %1713, %v1657_v40   ;;  %v1111_v40 = vpack.c.bf16 %v2570_v8, %v2567_v30 }
 0x807   :  { %1237 = vperm.xlu1 %1714, %v1658_v41  }
 0x80a   :  { %1333 = vperm.xlu0 %1713, %v1691_v11  }
 0x80b   :  { %1338 = vperm.xlu1 %1714, %v1692_v12  }
 0x80e   :  { %1343 = vperm.xlu0 %1713, %v1693_v13  }
 0x80f   :  { %1348 = vperm.xlu1 %1714, %v1694_v16  }
 0x812   :  { %1438 = vperm.xlu0 %1713, %v1434_v18  }
 0x813   :  { %1443 = vperm.xlu1 %1714, %v1435_v20  }
 0x860   :  { %v1837_v32 = vpop.permute.xlu0 %1836 }
 0x861   :  { %v1839_v33 = vunpack.i.h.bf16 %v1837_v32  ;;  %v1838_v34 = vunpack.i.l.bf16 %v1837_v32  ;;  %v1842_v53 = vpop.permute.xlu1 %1841 }
 0x862   :  { %v1844_v35 = vunpack.i.h.bf16 %v1842_v53  ;;  %v1843_v36 = vunpack.i.l.bf16 %v1842_v53 }
 0x864   :  { %v1130_v37 = vsel %vm1129_vm10, %v1838_v34, %v1843_v36  ;;  %v1131_v56 = vsel %vm1129_vm10, %v1839_v33, %v1844_v35  ;;  %v1134_v43 = vsel %vm1129_vm10, %v1843_v36, %v1838_v34  ;;  %v1135_v45 = vsel %vm1129_vm10, %v1844_v35, %v1839_v33  ;;  %v1892_v35 = vld [vmem:[%s2752_s4 + $0x30] sm:$0xff]   ;;  %v1893_v36 = vld [vmem:[%s2752_s4 + $0x38] sm:$0xff]  }
 0x865   :  { %v1662_v1 = vpack.c.bf16 %v1131_v56, %v1130_v37  ;;  %v1665_v3 = vpack.c.bf16 %v1135_v45, %v1134_v43 }
 0x867   :  { %1663 = vmatprep.subr.msk.bf16.mxu0 %vm1661_vm15, %v1662_v1 }
 0x868   :  { %v1847_v4 = vpop.permute.xlu0 %1846  ;;  %1666 = vmatpush1.bf16.msk.msra.mxu0 %vm1664_vm0, %v1665_v3 }
 0x869   :  { %v1849_v5 = vunpack.i.h.bf16 %v1847_v4  ;;  %v1848_v48 = vunpack.i.l.bf16 %v1847_v4  ;;  %v1852_v49 = vpop.permute.xlu1 %1851 }
 0x86a   :  { %v1854_v50 = vunpack.i.h.bf16 %v1852_v49  ;;  %v1853_v51 = vunpack.i.l.bf16 %v1852_v49 }
 0x86c   :  { %v1132_v57 = vsel %vm1129_vm10, %v1848_v48, %v1853_v51  ;;  %v1133_v58 = vsel %vm1129_vm10, %v1849_v5, %v1854_v50  ;;  %v1136_v59 = vsel %vm1129_vm10, %v1853_v51, %v1848_v48  ;;  %v1137_v62 = vsel %vm1129_vm10, %v1854_v50, %v1849_v5  ;;  %v1857_v63 = vpop.permute.xlu0 %1856 }
 0x86d   :  { %v1668_v17 = vpack.c.bf16 %v1133_v58, %v1132_v57  ;;  %v1671_v0 = vpack.c.bf16 %v1137_v62, %v1136_v59  ;;  %v1862_v19 = vpop.permute.xlu1 %1861  ;;  %v1859_v6 = vunpack.i.h.bf16 %v1857_v63  ;;  %v1858_v7 = vunpack.i.l.bf16 %v1857_v63 }
 0x86e   :  { %v1864_v24 = vunpack.i.h.bf16 %v1862_v19  ;;  %v1863_v26 = vunpack.i.l.bf16 %v1862_v19 }
 0x86f   :  { %1669 = vmatprep.subr.msk.bf16.mxu0 %vm1661_vm15, %v1668_v17 }
 0x870   :  { %1672 = vmatpush1.bf16.msk.msra.mxu0 %vm1664_vm0, %v1671_v0  ;;  %v1867_v25 = vpop.permute.xlu0 %1866  ;;  %v1183_v38 = vsel %vm1178_vm2, %v1863_v26, %v1858_v7  ;;  %v1184_v39 = vsel %vm1178_vm2, %v1864_v24, %v1859_v6  ;;  %v1179_v20 = vsel %vm1178_vm2, %v1858_v7, %v1863_v26  ;;  %v1180_v42 = vsel %vm1178_vm2, %v1859_v6, %v1864_v24 }
 0x871   :  { %v1872_v44 = vpop.permute.xlu1 %1871  ;;  %1260 = vmatprep.subr.bf16.mxu0 %v1109_v22  ;;  %v1869_v11 = vunpack.i.h.bf16 %v1867_v25  ;;  %v1868_v12 = vunpack.i.l.bf16 %v1867_v25  ;;  %v1674_v21 = vpack.c.bf16 %v1184_v39, %v1183_v38  ;;  %v1677_v32 = vpack.c.bf16 %v1180_v42, %v1179_v20  ;;  %v1895_v38 = vld [vmem:[%s2754_s6 + $0x38] sm:$0xff]  }
 0x872   :  { %v1874_v13 = vunpack.i.h.bf16 %v1872_v44  ;;  %v1873_v16 = vunpack.i.l.bf16 %v1872_v44 }
 0x874   :  { %1261 = vmatpush1.bf16.msra.mxu0 %v1108_v9  ;;  %v1185_v28 = vsel %vm1178_vm2, %v1873_v16, %v1868_v12  ;;  %v1186_v31 = vsel %vm1178_vm2, %v1874_v13, %v1869_v11  ;;  %v1181_v33 = vsel %vm1178_vm2, %v1868_v12, %v1873_v16  ;;  %v1182_v34 = vsel %vm1178_vm2, %v1869_v11, %v1874_v13 }
 0x875   :  { %1262 = vmatprep.subr.bf16.mxu0 %v1111_v40  ;;  %v1680_v53 = vpack.c.bf16 %v1186_v31, %v1185_v28  ;;  %v1683_v54 = vpack.c.bf16 %v1182_v34, %v1181_v33 }
 0x878   :  { %1263 = vmatpush1.bf16.msra.mxu0 %v1110_v46 }
 0x879   :  { %1675 = vmatprep.subr.msk.bf16.mxu0 %vm1673_vm4, %v1674_v21 }
 0x87c   :  { %1678 = vmatpush1.bf16.msk.msra.mxu0 %vm1676_vm6, %v1677_v32 }
 0x87d   :  { %1681 = vmatprep.subr.msk.bf16.mxu0 %vm1673_vm4, %v1680_v53 }
 0x880   :  { %1684 = vmatpush1.bf16.msk.msra.mxu0 %vm1676_vm6, %v1683_v54 }
 0x881   :  { %v1223_v47 = vpop.permute.xlu0 %1222 }
 0x882   :  { %v1228_v43 = vpop.permute.xlu1 %1227 }
 0x883   :  { %1685 = vmatmul.mubr.msk.bf16.vlgmr.msra.gmra.mrb[32].mxu0 %vm290_vm13, %v1892_v35 }
 0x884   :  { %1298 = vmatprep.mubr.bf16.mxu0 %v1922_v2 }
 0x885   :  { %v1233_v57 = vpop.permute.xlu0 %1232 }
 0x886   :  { %v1238_v17 = vpop.permute.xlu1 %1237 }
 0x889   :  { %v1334_v39 = vpop.permute.xlu0 %1333 }
 0x88a   :  { %v1339_v12 = vpop.permute.xlu1 %1338 }
 0x88b   :  { %1686 = vmatmul.mubr.msk.bf16.gmra.mrb[36].mxu0 %vm290_vm13, %v1893_v36 }
 0x88e   :  { %v1349_v35 = vpop.permute.xlu1 %1348 }
 0x956   :  { %v1290_v55 = vpop.f32.mrb[32].mxu0 }
 0x957   :  { %v1291_v37 = vadd.f32 %v1290_v55, %v1223_v47  ;;  %v1292_v56 = vpop.f32.mrb[33].mxu0 }
 0x958   :  { %v1293_v45 = vadd.f32 %v1292_v56, %v1223_v47  ;;  %v1294_v1 = vpop.f32.mrb[34].mxu0 }
 0x959   :  { %v1295_v3 = vadd.f32 %v1294_v1, %v1228_v43  ;;  %v1296_v4 = vpop.f32.mrb[35].mxu0  ;;  %v1309_v48 = vmax.f32 %v1291_v37, 0.0  ;;  %v1896_v1 = vld [vmem:[%s2756_s8] sm:$0xff]   ;;  %s1898_s8 = scalar_lea.vmem %s1507_s22, 512 }
 0x95a   :  { %v1297_v5 = vadd.f32 %v1296_v4, %v1228_v43  ;;  %v1310_v50 = vmax.f32 %v1293_v45, 0.0  ;;  %p1899_p0 = scmp.ne.s32.totalorder %s1507_s22, %s1898_s8  ;;  %p1904_p2 = scmp.lt.s32.totalorder %s1898_s8, %s1898_s8 }
 0x95b   :  { %v1311_v49 = vmax.f32 %v1295_v3, 0.0 }
 0x95c   :  { %v1312_v51 = vmax.f32 %v1297_v5, 0.0  ;;  %v1444_v5 = vpop.permute.xlu1 %1443  ;;  %p1905_p3 = por %p1904_p2, %p1903_p1 }
 0x95d   :  { %v1322_v52 = vpack.c.bf16 %v1311_v49, %v1309_v48 }
 0x95e   :  { %v1323_v58 = vpack.c.bf16 %v1312_v51, %v1310_v50  ;;  %v1300_v59 = vpop.f32.mrb[36].mxu0  ;;  %p1906_p4 = pnand %p1905_p3, %p1899_p0 }
 0x95f   :  { %v1301_v62 = vadd.f32 %v1300_v59, %v1233_v57  ;;  %v1302_v63 = vpop.f32.mrb[37].mxu0 }
 0x960   :  { %v1303_v0 = vadd.f32 %v1302_v63, %v1233_v57  ;;  %v1304_v19 = vpop.f32.mrb[38].mxu0  ;;  %1367 = vmatprep.subr.bf16.mxu1 %v1323_v58 }
 0x961   :  { %v1305_v22 = vadd.f32 %v1304_v19, %v1238_v17  ;;  %v1306_v23 = vpop.f32.mrb[39].mxu0  ;;  %1368 = vmatpush1.bf16.msra.mxu1 %v1322_v52  ;;  %v1313_v7 = vmax.f32 %v1301_v62, 0.0 }
 0x962   :  { %v1307_v6 = vadd.f32 %v1306_v23, %v1238_v17  ;;  %v1314_v26 = vmax.f32 %v1303_v0, 0.0 }
 0x963   :  { %v1315_v24 = vmax.f32 %v1305_v22, 0.0 }
 0x964   :  { %v1316_v25 = vmax.f32 %v1307_v6, 0.0 }
 0x965   :  { %v1324_v44 = vpack.c.bf16 %v1315_v24, %v1313_v7 }
 0x966   :  { %v1325_v9 = vpack.c.bf16 %v1316_v25, %v1314_v26 }
 0x968   :  { %1369 = vmatprep.subr.bf16.mxu1 %v1325_v9 }
 0x969   :  { %1370 = vmatpush1.bf16.msra.mxu1 %v1324_v44 }
 0x96c   :  { %1697 = vmatmul.mubr.msk.bf16.vlgmr.msra.gmra.mrb[24].mxu1 %vm400_vm14, %v1894_v10 }
 0x96d   :  { %1409 = vmatprep.mubr.bf16.mxu1 %v1922_v2 }
 0x974   :  { %1698 = vmatmul.mubr.msk.bf16.gmra.mrb[28].mxu1 %vm400_vm14, %v1895_v38 }
 0x975   :  { %1486 = vmatprep.mubr.bf16.mxu1 %v1922_v2  ;;  %v1344_v2 = vpop.permute.xlu0 %1343 }
 0x979   :  { %v1439_v3 = vpop.permute.xlu0 %1438 }
 0xa3f   :  { %v1401_v40 = vpop.f32.mrb[24].mxu1 }
 0xa40   :  { %v1402_v41 = vadd.f32 %v1401_v40, %v1334_v39  ;;  %v1403_v11 = vpop.f32.mrb[25].mxu1 }
 0xa41   :  { %v1404_v13 = vadd.f32 %v1403_v11, %v1334_v39  ;;  %v1405_v16 = vpop.f32.mrb[26].mxu1 }
 0xa42   :  { %v1406_v46 = vadd.f32 %v1405_v16, %v1339_v12  ;;  %v1407_v18 = vpop.f32.mrb[27].mxu1  ;;  %v1420_v42 = vadd.f32 %v1402_v41, %v2545_v60 }
 0xa43   :  { %v1408_v20 = vadd.f32 %v1407_v18, %v1339_v12  ;;  %v1421_v28 = vadd.f32 %v1404_v13, %v2551_v14 }
 0xa44   :  { %v1422_v21 = vadd.f32 %v1406_v46, %v2548_v61 }
 0xa45   :  { %v1423_v31 = vadd.f32 %v1408_v20, %v2554_v15 }
 0xa46   :  { %v1430_v32 = vpack.c.bf16 %v1422_v21, %v1420_v42 }
 0xa47   :  { %v1411_v33 = vpop.f32.mrb[28].mxu1  ;;  %v1431_v34 = vpack.c.bf16 %v1423_v31, %v1421_v28 }
 0xa48   :  { %v1412_v53 = vadd.f32 %v1411_v33, %v1344_v2  ;;  %v1413_v54 = vpop.f32.mrb[29].mxu1 }
 0xa49   :  { %v1414_v36 = vadd.f32 %v1413_v54, %v1344_v2  ;;  %v1415_v47 = vpop.f32.mrb[30].mxu1  ;;  %1454 = vmatprep.subr.bf16.mxu1 %v1431_v34 }
 0xa4a   :  { %v1416_v55 = vadd.f32 %v1415_v47, %v1349_v35  ;;  %v1417_v37 = vpop.f32.mrb[31].mxu1  ;;  %1455 = vmatpush1.bf16.msra.mxu1 %v1430_v32  ;;  %v1424_v61 = vadd.f32 %v1412_v53, %v2561_v27 }
 0xa4b   :  { %v1418_v60 = vadd.f32 %v1417_v37, %v1349_v35  ;;  %v1425_v15 = vadd.f32 %v1414_v36, %v2567_v30 }
 0xa4c   :  { %v1426_v14 = vadd.f32 %v1416_v55, %v2564_v29 }
 0xa4d   :  { %v1427_v56 = vadd.f32 %v1418_v60, %v2570_v8 }
 0xa4e   :  { %v1432_v43 = vpack.c.bf16 %v1426_v14, %v1424_v61 }
 0xa4f   :  { %v1433_v45 = vpack.c.bf16 %v1427_v56, %v1425_v15 }
 0xa51   :  { %1456 = vmatprep.subr.bf16.mxu1 %v1433_v45 }
 0xa52   :  { %1457 = vmatpush1.bf16.msra.mxu1 %v1432_v43 }
 0xa55   :  { %1700 = vmatmul.mubr.msk.bf16.vlgmr.msra.gmra.mrb[32].mxu1 %vm400_vm14, %v1896_v1 }
 0xb28   :  { %v1488_v4 = vpop.f32.mrb[32].mxu1 }
 0xb29   :  { %v1489_v27 = vadd.f32 %v1488_v4, %v1439_v3  ;;  %v1490_v29 = vpop.f32.mrb[33].mxu1 }
 0xb2a   :  { %v1491_v30 = vadd.f32 %v1490_v29, %v1439_v3  ;;  %v1492_v48 = vpop.f32.mrb[34].mxu1 }
 0xb2b   :  { %1497 = vst [vmem:[#allocation2] sm:$0xff] %v1489_v27  ;;  %v1493_v8 = vadd.f32 %v1492_v48, %v1444_v5  ;;  %v1494_v49 = vpop.f32.mrb[35].mxu1 }
 0xb2c   :  { %1498 = vst [vmem:[#allocation2 + $0x8] sm:$0xff] %v1491_v30  ;;  %v1495_v50 = vadd.f32 %v1494_v49, %v1444_v5 }
 0xb2d   :  { %1499 = vst [vmem:[#allocation2 + $0x10] sm:$0xff] %v1493_v8 }
 0xb2e   :  { %1500 = vst [vmem:[#allocation2 + $0x18] sm:$0xff] %v1495_v50 }
 0xb2f   :  { %1909 = shalt.err (!%p1906_p4)
}
 0xb30   :  { %s1910_s25 = scalar_lea.hbm %s2758_s10, 512 }
 0xb31   :  { %p1911_p5 = scmp.ne.s32.totalorder %s2758_s10, %s1910_s25  ;;  %p1914_p6 = scmp.lt.u32.totalorder %s1910_s25, %s2758_s10 }
 0xb33   :  { %p1916_p7 = pnand %p1914_p6, %p1911_p5 }
 0xb35   :  { %1919 = shalt.err (!%p1916_p7)
}
 0xb36   :  { %s1932_s28 = smov 256   ;;  %s1933_s29 = smov 16  }
 0xb37   :  { %1512 = dma.vmem_to_hbm [thread:$0]  %s1507_s22, 512, %s2758_s10, [#allocation3], %s1932_s28, %s1932_s28, %s1933_s29  }
 0xb38   :  { %1920 = dma.done.wait [#allocation3], 512  }
 0xb39   :  { %1921 = vsyncadd [#allocation3], 4294966784 }
 0xb3a   :  { %1516 = vsyncpa [#allocation3], 1 }

</bundles_post_ra>
